<compile_context>
chip_gen: v5e
topology: v5e:2x2
jax: 0.10.0
libtpu: 0.0.40
codegen_flags: <defaults>
</compile_context>

<pallas_src>
import functools
import math

import jax
import jax.numpy as jnp
from jax import lax
from jax.experimental import pallas as pl
from jax.experimental.pallas import tpu as pltpu


def _cross_attn_kernel(xd_ref, xe_ref,
                       wq_ref, wk_ref, wv_ref, wo_ref,
                       bq_ref, bk_ref, bv_ref, bo_ref,
                       o_ref, *, exact_softmax):
    """One (batch row, query tile) step of CrossAttention3D.

    xd_ref : (tq, Dp)  decoder tile (f32)
    xe_ref : (Se, Dp)  full encoder sequence for this batch row (f32)
    w*_ref : (Dp, Dp)  pre-transposed (in, out) weights; Wq pre-scaled by
                       1/sqrt(D); dtype = MXU operand dtype (bf16 or f32)
    b*_ref : (1, Dp)   biases (f32); bq pre-scaled by 1/sqrt(D)
    o_ref  : (tq, Dp)  output tile = out_proj(attn(x_dec, x_enc)) + x_dec
    """
    cd = wq_ref.dtype  # MXU operand dtype (bf16 in fast mode, f32 in exact mode)

    # --- Projections (f32 accumulation on the MXU) ---
    q = jnp.dot(xd_ref[...].astype(cd), wq_ref[...],
                preferred_element_type=jnp.float32) + bq_ref[...]       # (tq, Dp)
    xe = xe_ref[...].astype(cd)
    k = jnp.dot(xe, wk_ref[...], preferred_element_type=jnp.float32) + bk_ref[...]
    v = jnp.dot(xe, wv_ref[...], preferred_element_type=jnp.float32) + bv_ref[...]

    # --- Scores: contract feature dims directly (q @ k^T); scale already
    # folded into the Q projection.  Softmax statistics stay f32. ---
    s = lax.dot_general(q.astype(cd), k.astype(cd),
                        (((1,), (1,)), ((), ())),
                        preferred_element_type=jnp.float32)             # (tq, Se)
    m = jnp.max(s, axis=-1, keepdims=True)
    p = jnp.exp(s - m)                                                  # unnormalized
    denom = jnp.sum(p, axis=-1, keepdims=True)                          # (tq, 1)

    # --- PV first, normalize after (tq*Dp multiplies instead of tq*Se) ---
    ctx = jnp.dot(p.astype(cd), v.astype(cd),
                  preferred_element_type=jnp.float32)                   # (tq, Dp)
    if exact_softmax:
        ctx = ctx / denom
    else:
        ctx = ctx * pl.reciprocal(denom, approx=True)                   # EUP slot

    # --- Output projection + residual (re-read x_dec: short live range) ---
    out = jnp.dot(ctx.astype(cd), wo_ref[...],
                  preferred_element_type=jnp.float32) + bo_ref[...]
    o_ref[...] = (out + xd_ref[...]).astype(o_ref.dtype)


def _vmem_capacity_bytes():
    try:
        info = pltpu.get_tpu_info()
        for name in ("vmem_capacity_bytes", "vmem_size_bytes", "vmem_bytes"):
            v = getattr(info, name, None)
            if v:
                return int(v)
    except Exception:
        pass
    return 64 * 1024 * 1024  # conservative: v7x per-TensorCore VMEM


def _block_q_candidates(sd):
    cands = {sd}
    cands.update(q for q in range(8, sd, 8) if sd % q == 0)
    return sorted(cands, reverse=True)


def _estimate_vmem_bytes(tq, se, dp, w_bytes):
    f32 = 4
    io = 2 * 2 * tq * dp * f32                 # x_dec block + out block, double-buffered
    xenc = 2 * se * dp * f32                   # x_enc block, double-buffered
    consts = 2 * (4 * dp * dp * w_bytes + 4 * dp * f32)   # 4 weights + 4 biases
    live = ((tq + 2 * se) * dp * f32           # q, k, v
            + 2 * tq * se * f32                # scores + exp(scores)
            + 2 * tq * dp * f32                # ctx + out
            + ((tq + 2 * se) * dp + tq * se) * 2)  # bf16 operand copies
    return io + xenc + consts + live


def cross_attention_3d(x_dec, x_enc, params, *, block_q=None,
                       matmul_dtype=jnp.bfloat16, pad_lanes=True,
                       single_buffer_consts=True):
    """CrossAttention3D forward.  x_dec: (B, Sd, D), x_enc: (B, Se, D).

    params use torch nn.Linear layout: "w*" are (out, in), "b*" are (out,).
    matmul_dtype: MXU operand dtype (bf16 recommended on v5e/v6e/v7x); None
      keeps everything f32 with exact softmax division.
    """
    B, Sd, D = x_dec.shape
    Be, Se, De = x_enc.shape
    assert Be == B and De == D, "x_dec / x_enc mismatch"

    scale = 1.0 / math.sqrt(D)                 # scale uses the ORIGINAL dim
    Dp = D
    if pad_lanes and D % 128 != 0:
        Dp = ((D + 127) // 128) * 128          # lane-dense feature dim

    # ---- one-time parameter transforms (wrapper-side, not per grid step) ----
    def prep_w(w):                             # (out, in) -> (in, out), zero-pad
        wt = w.T
        if Dp != D:
            wt = jnp.pad(wt, ((0, Dp - D), (0, Dp - D)))
        return wt

    def prep_b(b):
        if Dp != D:
            b = jnp.pad(b, (0, Dp - D))
        return b.reshape(1, Dp).astype(jnp.float32)

    wq_t = prep_w(params["wq"] * scale)        # fold 1/sqrt(D) into the Q proj
    wk_t = prep_w(params["wk"])
    wv_t = prep_w(params["wv"])
    wo_t = prep_w(params["wo"])
    bq = prep_b(params["bq"] * scale)
    bk = prep_b(params["bk"])
    bv = prep_b(params["bv"])
    bo = prep_b(params["bo"])

    if matmul_dtype is not None:
        wq_t, wk_t, wv_t, wo_t = (w.astype(matmul_dtype)
                                  for w in (wq_t, wk_t, wv_t, wo_t))
    w_bytes = jnp.dtype(wq_t.dtype).itemsize

    xd, xe = x_dec, x_enc
    if Dp != D:
        xd = jnp.pad(x_dec, ((0, 0), (0, 0), (0, Dp - D)))
        xe = jnp.pad(x_enc, ((0, 0), (0, 0), (0, Dp - D)))

    # ---- VMEM-aware tile selection ----
    vmem_cap = _vmem_capacity_bytes()
    budget = int(0.6 * vmem_cap)
    cands = _block_q_candidates(Sd)
    if block_q is None:
        block_q = cands[-1]
        for q in cands:                        # largest tile that fits the budget
            if _estimate_vmem_bytes(q, Se, Dp, w_bytes) <= budget:
                block_q = q
                break
    assert Sd % block_q == 0, "block_q must divide Sd"
    # v7x has 2 TensorCores: make sure a 'parallel' axis has >= 2 steps.
    if B * (Sd // block_q) == 1:
        smaller = [q for q in cands if q < block_q]
        if smaller:
            block_q = smaller[0]
    grid = (B, Sd // block_q)

    est = _estimate_vmem_bytes(block_q, Se, Dp, w_bytes)
    vmem_limit = int(min(0.85 * vmem_cap, max(2.5 * est, 32 * 1024 * 1024)))

    kernel = functools.partial(_cross_attn_kernel,
                               exact_softmax=matmul_dtype is None)
    out_shape = jax.ShapeDtypeStruct((B, Sd, Dp), x_dec.dtype)
    operands = (xd, xe, wq_t, wk_t, wv_t, wo_t, bq, bk, bv, bo)

    def build(buffer_consts_once):
        # Grid-constant blocks: single-buffer them when supported (pure VMEM win).
        const_kw = {"pipeline_mode": pl.Buffered(1)} if buffer_consts_once else {}

        def const(shape):
            return pl.BlockSpec(shape, lambda b, i: (0, 0), **const_kw)

        in_specs = [
            pl.BlockSpec((None, block_q, Dp), lambda b, i: (b, i, 0)),   # x_dec
            pl.BlockSpec((None, Se, Dp), lambda b, i: (b, 0, 0)),        # x_enc
            const((Dp, Dp)), const((Dp, Dp)), const((Dp, Dp)), const((Dp, Dp)),
            const((1, Dp)), const((1, Dp)), const((1, Dp)), const((1, Dp)),
        ]
        return pl.pallas_call(
            kernel,
            out_shape=out_shape,
            grid_spec=pltpu.PrefetchScalarGridSpec(
                num_scalar_prefetch=0,
                grid=grid,
                in_specs=in_specs,
                out_specs=pl.BlockSpec((None, block_q, Dp),
                                       lambda b, i: (b, i, 0)),
            ),
            compiler_params=pltpu.CompilerParams(
                dimension_semantics=("parallel", "parallel"),
                vmem_limit_bytes=vmem_limit),
        )

    out = None
    if single_buffer_consts:
        try:
            out = jax.block_until_ready(build(True)(*operands))
        except Exception:
            out = None  # pipeline_mode/Buffered(1) not supported here -> retry
    if out is None:
        out = build(False)(*operands)

    return out[..., :D] if Dp != D else out


def _reference(x_dec, x_enc, params):
    D = x_dec.shape[-1]
    q = x_dec @ params["wq"].T + params["bq"]
    k = x_enc @ params["wk"].T + params["bk"]
    v = x_enc @ params["wv"].T + params["bv"]
    attn = jax.nn.softmax(q @ jnp.swapaxes(k, -2, -1) / math.sqrt(D), axis=-1)
    x = attn @ v
    return x @ params["wo"].T + params["bo"] + x_dec


if __name__ == "__main__":
    B, Sd, Se, D = 2, 8, 8, 32

    key = jax.random.PRNGKey(0)
    keys = jax.random.split(key, 10)

    # Deterministic synthetic parameters (torch nn.Linear shapes: W (out,in), b (out,))
    s = 1.0 / math.sqrt(D)
    params = {
        "wq": jax.random.uniform(keys[0], (D, D), jnp.float32, -s, s),
        "bq": jax.random.uniform(keys[1], (D,), jnp.float32, -s, s),
        "wk": jax.random.uniform(keys[2], (D, D), jnp.float32, -s, s),
        "bk": jax.random.uniform(keys[3], (D,), jnp.float32, -s, s),
        "wv": jax.random.uniform(keys[4], (D, D), jnp.float32, -s, s),
        "bv": jax.random.uniform(keys[5], (D,), jnp.float32, -s, s),
        "wo": jax.random.uniform(keys[6], (D, D), jnp.float32, -s, s),
        "bo": jax.random.uniform(keys[7], (D,), jnp.float32, -s, s),
    }

    x_dec = jax.random.normal(keys[8], (B, Sd, D), jnp.float32)
    x_enc = jax.random.normal(keys[9], (B, Se, D), jnp.float32)

    ref = _reference(x_dec, x_enc, params)

    # High-precision mode: f32 MXU operands + exact softmax division.
    out_f32 = jax.block_until_ready(
        cross_attention_3d(x_dec, x_enc, params, matmul_dtype=None))
    assert out_f32.shape == (B, Sd, D)
    assert jnp.allclose(out_f32, ref, atol=5e-3, rtol=5e-3), "f32 mode mismatch"

    # Default fast mode: bf16 MXU operands, f32 accumulation / softmax stats.
    out_bf16 = jax.block_until_ready(cross_attention_3d(x_dec, x_enc, params))
    assert out_bf16.shape == (B, Sd, D)
    assert jnp.allclose(out_bf16, ref, atol=3e-2, rtol=3e-2), "bf16 mode mismatch"

    print("KERNEL_OK")
</pallas_src>

<mosaic_0001>
module attributes {stable_mosaic.version = 11 : i64} {
  func.func @_cross_attn_kernel(%arg0: i32, %arg1: i32, %arg2: memref<1x8x128xf32, #tpu.memory_space<vmem>>, %arg3: memref<1x8x128xf32, #tpu.memory_space<vmem>>, %arg4: memref<128x128xf32, #tpu.memory_space<vmem>>, %arg5: memref<128x128xf32, #tpu.memory_space<vmem>>, %arg6: memref<128x128xf32, #tpu.memory_space<vmem>>, %arg7: memref<128x128xf32, #tpu.memory_space<vmem>>, %arg8: memref<1x128xf32, #tpu.memory_space<vmem>>, %arg9: memref<1x128xf32, #tpu.memory_space<vmem>>, %arg10: memref<1x128xf32, #tpu.memory_space<vmem>>, %arg11: memref<1x128xf32, #tpu.memory_space<vmem>>, %arg12: memref<1x8x128xf32, #tpu.memory_space<vmem>>) attributes {dimension_semantics = [#tpu.dimension_semantics<parallel>, #tpu.dimension_semantics<parallel>], iteration_bounds = array<i64: 2, 1>, scalar_prefetch = 0 : i64, scratch_operands = 0 : i64, tpu.core_type = #tpu.core_type<tc>, window_params = [{transform_indices = @transform_0, window_bounds = array<i64: 1, 8, 128>}, {transform_indices = @transform_1, window_bounds = array<i64: 1, 8, 128>}, {pipeline_mode = #tpu.pipeline_mode<synchronous>, transform_indices = @transform_2, window_bounds = array<i64: 128, 128>}, {pipeline_mode = #tpu.pipeline_mode<synchronous>, transform_indices = @transform_3, window_bounds = array<i64: 128, 128>}, {pipeline_mode = #tpu.pipeline_mode<synchronous>, transform_indices = @transform_4, window_bounds = array<i64: 128, 128>}, {pipeline_mode = #tpu.pipeline_mode<synchronous>, transform_indices = @transform_5, window_bounds = array<i64: 128, 128>}, {pipeline_mode = #tpu.pipeline_mode<synchronous>, transform_indices = @transform_6, window_bounds = array<i64: 1, 128>}, {pipeline_mode = #tpu.pipeline_mode<synchronous>, transform_indices = @transform_7, window_bounds = array<i64: 1, 128>}, {pipeline_mode = #tpu.pipeline_mode<synchronous>, transform_indices = @transform_8, window_bounds = array<i64: 1, 128>}, {pipeline_mode = #tpu.pipeline_mode<synchronous>, transform_indices = @transform_9, window_bounds = array<i64: 1, 128>}, {transform_indices = @transform_10, window_bounds = array<i64: 1, 8, 128>}]} {
    %c0 = arith.constant 0 : index
    %c0_0 = arith.constant 0 : index
    %c0_1 = arith.constant 0 : index
    %0 = vector.load %arg2[%c0, %c0_0, %c0_1] : memref<1x8x128xf32, #tpu.memory_space<vmem>>, vector<1x8x128xf32>
    %1 = vector.shape_cast %0 : vector<1x8x128xf32> to vector<8x128xf32>
    %c0_2 = arith.constant 0 : index
    %c0_3 = arith.constant 0 : index
    %2 = vector.load %arg4[%c0_2, %c0_3] : memref<128x128xf32, #tpu.memory_space<vmem>>, vector<128x128xf32>
    %cst = arith.constant dense<0.000000e+00> : vector<8x128xf32>
    %3 = tpu.matmul %1, %2, %cst {dimension_numbers = #tpu.dot_dimension_numbers<[1], [0], [0], [1], [0, 0, 1, 1], [], []>} : vector<8x128xf32>, vector<128x128xf32>, vector<8x128xf32> -> vector<8x128xf32>
    %c0_4 = arith.constant 0 : index
    %c0_5 = arith.constant 0 : index
    %4 = vector.load %arg8[%c0_4, %c0_5] : memref<1x128xf32, #tpu.memory_space<vmem>>, vector<1x128xf32>
    %5 = vector.broadcast %4 : vector<1x128xf32> to vector<8x128xf32>
    %6 = arith.addf %3, %5 : vector<8x128xf32>
    %c0_6 = arith.constant 0 : index
    %c0_7 = arith.constant 0 : index
    %c0_8 = arith.constant 0 : index
    %7 = vector.load %arg3[%c0_6, %c0_7, %c0_8] : memref<1x8x128xf32, #tpu.memory_space<vmem>>, vector<1x8x128xf32>
    %8 = vector.shape_cast %7 : vector<1x8x128xf32> to vector<8x128xf32>
    %c0_9 = arith.constant 0 : index
    %c0_10 = arith.constant 0 : index
    %9 = vector.load %arg5[%c0_9, %c0_10] : memref<128x128xf32, #tpu.memory_space<vmem>>, vector<128x128xf32>
    %cst_11 = arith.constant dense<0.000000e+00> : vector<8x128xf32>
    %10 = tpu.matmul %8, %9, %cst_11 {dimension_numbers = #tpu.dot_dimension_numbers<[1], [0], [0], [1], [0, 0, 1, 1], [], []>} : vector<8x128xf32>, vector<128x128xf32>, vector<8x128xf32> -> vector<8x128xf32>
    %c0_12 = arith.constant 0 : index
    %c0_13 = arith.constant 0 : index
    %11 = vector.load %arg9[%c0_12, %c0_13] : memref<1x128xf32, #tpu.memory_space<vmem>>, vector<1x128xf32>
    %12 = vector.broadcast %11 : vector<1x128xf32> to vector<8x128xf32>
    %13 = arith.addf %10, %12 : vector<8x128xf32>
    %c0_14 = arith.constant 0 : index
    %c0_15 = arith.constant 0 : index
    %14 = vector.load %arg6[%c0_14, %c0_15] : memref<128x128xf32, #tpu.memory_space<vmem>>, vector<128x128xf32>
    %cst_16 = arith.constant dense<0.000000e+00> : vector<8x128xf32>
    %15 = tpu.matmul %8, %14, %cst_16 {dimension_numbers = #tpu.dot_dimension_numbers<[1], [0], [0], [1], [0, 0, 1, 1], [], []>} : vector<8x128xf32>, vector<128x128xf32>, vector<8x128xf32> -> vector<8x128xf32>
    %c0_17 = arith.constant 0 : index
    %c0_18 = arith.constant 0 : index
    %16 = vector.load %arg10[%c0_17, %c0_18] : memref<1x128xf32, #tpu.memory_space<vmem>>, vector<1x128xf32>
    %17 = vector.broadcast %16 : vector<1x128xf32> to vector<8x128xf32>
    %18 = arith.addf %15, %17 : vector<8x128xf32>
    %cst_19 = arith.constant dense<0.000000e+00> : vector<8x8xf32>
    %19 = tpu.matmul %6, %13, %cst_19 {dimension_numbers = #tpu.dot_dimension_numbers<[1], [1], [0], [0], [0, 0, 1, 0], [], []>} : vector<8x128xf32>, vector<8x128xf32>, vector<8x8xf32> -> vector<8x8xf32>
    %cst_20 = arith.constant dense<0xFF800000> : vector<8xf32>
    %20 = vector.multi_reduction <maximumf>, %19, %cst_20 [1] : vector<8x8xf32> to vector<8xf32>
    %21 = vector.shape_cast %20 : vector<8xf32> to vector<8x1xf32>
    %22 = vector.broadcast %21 : vector<8x1xf32> to vector<8x8xf32>
    %23 = arith.subf %19, %22 : vector<8x8xf32>
    %24 = math.exp %23 : vector<8x8xf32>
    %cst_21 = arith.constant dense<0.000000e+00> : vector<8xf32>
    %25 = vector.multi_reduction <add>, %24, %cst_21 [1] : vector<8x8xf32> to vector<8xf32>
    %26 = vector.shape_cast %25 : vector<8xf32> to vector<8x1xf32>
    %cst_22 = arith.constant dense<0.000000e+00> : vector<8x128xf32>
    %27 = tpu.matmul %24, %18, %cst_22 {dimension_numbers = #tpu.dot_dimension_numbers<[1], [0], [0], [1], [0, 0, 1, 1], [], []>} : vector<8x8xf32>, vector<8x128xf32>, vector<8x128xf32> -> vector<8x128xf32>
    %28 = vector.broadcast %26 : vector<8x1xf32> to vector<8x128xf32>
    %29 = arith.divf %27, %28 : vector<8x128xf32>
    %c0_23 = arith.constant 0 : index
    %c0_24 = arith.constant 0 : index
    %30 = vector.load %arg7[%c0_23, %c0_24] : memref<128x128xf32, #tpu.memory_space<vmem>>, vector<128x128xf32>
    %cst_25 = arith.constant dense<0.000000e+00> : vector<8x128xf32>
    %31 = tpu.matmul %29, %30, %cst_25 {dimension_numbers = #tpu.dot_dimension_numbers<[1], [0], [0], [1], [0, 0, 1, 1], [], []>} : vector<8x128xf32>, vector<128x128xf32>, vector<8x128xf32> -> vector<8x128xf32>
    %c0_26 = arith.constant 0 : index
    %c0_27 = arith.constant 0 : index
    %32 = vector.load %arg11[%c0_26, %c0_27] : memref<1x128xf32, #tpu.memory_space<vmem>>, vector<1x128xf32>
    %33 = vector.broadcast %32 : vector<1x128xf32> to vector<8x128xf32>
    %34 = arith.addf %31, %33 : vector<8x128xf32>
    %c0_28 = arith.constant 0 : index
    %c0_29 = arith.constant 0 : index
    %c0_30 = arith.constant 0 : index
    %35 = vector.load %arg2[%c0_28, %c0_29, %c0_30] : memref<1x8x128xf32, #tpu.memory_space<vmem>>, vector<1x8x128xf32>
    %36 = vector.shape_cast %35 : vector<1x8x128xf32> to vector<8x128xf32>
    %37 = arith.addf %34, %36 : vector<8x128xf32>
    %c0_31 = arith.constant 0 : index
    %c0_32 = arith.constant 0 : index
    %c0_33 = arith.constant 0 : index
    %38 = vector.load %arg12[%c0_31, %c0_32, %c0_33] : memref<1x8x128xf32, #tpu.memory_space<vmem>>, vector<1x8x128xf32>
    %39 = vector.shape_cast %38 : vector<1x8x128xf32> to vector<8x128xf32>
    %40 = vector.shape_cast %37 : vector<8x128xf32> to vector<1x8x128xf32>
    tpu.vector_store %arg12[%c0_31, %c0_32, %c0_33], %40 {strides = array<i32>} : memref<1x8x128xf32, #tpu.memory_space<vmem>>, vector<1x8x128xf32>,
    return
  }
  func.func @transform_0(%arg0: i32, %arg1: i32) -> (i32, i32, i32) {
    %c0_i32 = arith.constant 0 : i32
    %c0_i32_0 = arith.constant 0 : i32
    return %arg0, %arg1, %c0_i32 : i32, i32, i32
  }
  func.func @transform_1(%arg0: i32, %arg1: i32) -> (i32, i32, i32) {
    %c0_i32 = arith.constant 0 : i32
    %c0_i32_0 = arith.constant 0 : i32
    %c0_i32_1 = arith.constant 0 : i32
    return %arg0, %c0_i32, %c0_i32_0 : i32, i32, i32
  }
  func.func @transform_2(%arg0: i32, %arg1: i32) -> (i32, i32) {
    %c0_i32 = arith.constant 0 : i32
    %c0_i32_0 = arith.constant 0 : i32
    %c0_i32_1 = arith.constant 0 : i32
    return %c0_i32, %c0_i32_0 : i32, i32
  }
  func.func @transform_3(%arg0: i32, %arg1: i32) -> (i32, i32) {
    %c0_i32 = arith.constant 0 : i32
    %c0_i32_0 = arith.constant 0 : i32
    %c0_i32_1 = arith.constant 0 : i32
    return %c0_i32, %c0_i32_0 : i32, i32
  }
  func.func @transform_4(%arg0: i32, %arg1: i32) -> (i32, i32) {
    %c0_i32 = arith.constant 0 : i32
    %c0_i32_0 = arith.constant 0 : i32
    %c0_i32_1 = arith.constant 0 : i32
    return %c0_i32, %c0_i32_0 : i32, i32
  }
  func.func @transform_5(%arg0: i32, %arg1: i32) -> (i32, i32) {
    %c0_i32 = arith.constant 0 : i32
    %c0_i32_0 = arith.constant 0 : i32
    %c0_i32_1 = arith.constant 0 : i32
    return %c0_i32, %c0_i32_0 : i32, i32
  }
  func.func @transform_6(%arg0: i32, %arg1: i32) -> (i32, i32) {
    %c0_i32 = arith.constant 0 : i32
    %c0_i32_0 = arith.constant 0 : i32
    %c0_i32_1 = arith.constant 0 : i32
    return %c0_i32, %c0_i32_0 : i32, i32
  }
  func.func @transform_7(%arg0: i32, %arg1: i32) -> (i32, i32) {
    %c0_i32 = arith.constant 0 : i32
    %c0_i32_0 = arith.constant 0 : i32
    %c0_i32_1 = arith.constant 0 : i32
    return %c0_i32, %c0_i32_0 : i32, i32
  }
  func.func @transform_8(%arg0: i32, %arg1: i32) -> (i32, i32) {
    %c0_i32 = arith.constant 0 : i32
    %c0_i32_0 = arith.constant 0 : i32
    %c0_i32_1 = arith.constant 0 : i32
    return %c0_i32, %c0_i32_0 : i32, i32
  }
  func.func @transform_9(%arg0: i32, %arg1: i32) -> (i32, i32) {
    %c0_i32 = arith.constant 0 : i32
    %c0_i32_0 = arith.constant 0 : i32
    %c0_i32_1 = arith.constant 0 : i32
    return %c0_i32, %c0_i32_0 : i32, i32
  }
  func.func @transform_10(%arg0: i32, %arg1: i32) -> (i32, i32, i32) {
    %c0_i32 = arith.constant 0 : i32
    %c0_i32_0 = arith.constant 0 : i32
    return %arg0, %arg1, %c0_i32 : i32, i32, i32
  }
}

module attributes {stable_mosaic.version = 11 : i64} {
  func.func @_cross_attn_kernel(%arg0: i32, %arg1: i32, %arg2: memref<1x8x128xf32, #tpu.memory_space<vmem>>, %arg3: memref<1x8x128xf32, #tpu.memory_space<vmem>>, %arg4: memref<128x128xf32, #tpu.memory_space<vmem>>, %arg5: memref<128x128xf32, #tpu.memory_space<vmem>>, %arg6: memref<128x128xf32, #tpu.memory_space<vmem>>, %arg7: memref<128x128xf32, #tpu.memory_space<vmem>>, %arg8: memref<1x128xf32, #tpu.memory_space<vmem>>, %arg9: memref<1x128xf32, #tpu.memory_space<vmem>>, %arg10: memref<1x128xf32, #tpu.memory_space<vmem>>, %arg11: memref<1x128xf32, #tpu.memory_space<vmem>>, %arg12: memref<1x8x128xf32, #tpu.memory_space<vmem>>) attributes {dimension_semantics = [#tpu.dimension_semantics<parallel>, #tpu.dimension_semantics<parallel>], iteration_bounds = array<i64: 2, 1>, scalar_prefetch = 0 : i64, scratch_operands = 0 : i64, tpu.core_type = #tpu.core_type<tc>, window_params = [{transform_indices = @transform_0, window_bounds = array<i64: 1, 8, 128>}, {transform_indices = @transform_1, window_bounds = array<i64: 1, 8, 128>}, {pipeline_mode = #tpu.pipeline_mode<synchronous>, transform_indices = @transform_2, window_bounds = array<i64: 128, 128>}, {pipeline_mode = #tpu.pipeline_mode<synchronous>, transform_indices = @transform_3, window_bounds = array<i64: 128, 128>}, {pipeline_mode = #tpu.pipeline_mode<synchronous>, transform_indices = @transform_4, window_bounds = array<i64: 128, 128>}, {pipeline_mode = #tpu.pipeline_mode<synchronous>, transform_indices = @transform_5, window_bounds = array<i64: 128, 128>}, {pipeline_mode = #tpu.pipeline_mode<synchronous>, transform_indices = @transform_6, window_bounds = array<i64: 1, 128>}, {pipeline_mode = #tpu.pipeline_mode<synchronous>, transform_indices = @transform_7, window_bounds = array<i64: 1, 128>}, {pipeline_mode = #tpu.pipeline_mode<synchronous>, transform_indices = @transform_8, window_bounds = array<i64: 1, 128>}, {pipeline_mode = #tpu.pipeline_mode<synchronous>, transform_indices = @transform_9, window_bounds = array<i64: 1, 128>}, {transform_indices = @transform_10, window_bounds = array<i64: 1, 8, 128>}]} {
    %c0 = arith.constant 0 : index
    %c0_0 = arith.constant 0 : index
    %c0_1 = arith.constant 0 : index
    %0 = vector.load %arg2[%c0, %c0_0, %c0_1] : memref<1x8x128xf32, #tpu.memory_space<vmem>>, vector<1x8x128xf32>
    %1 = vector.shape_cast %0 : vector<1x8x128xf32> to vector<8x128xf32>
    %c0_2 = arith.constant 0 : index
    %c0_3 = arith.constant 0 : index
    %2 = vector.load %arg4[%c0_2, %c0_3] : memref<128x128xf32, #tpu.memory_space<vmem>>, vector<128x128xf32>
    %cst = arith.constant dense<0.000000e+00> : vector<8x128xf32>
    %3 = tpu.matmul %1, %2, %cst {dimension_numbers = #tpu.dot_dimension_numbers<[1], [0], [0], [1], [0, 0, 1, 1], [], []>} : vector<8x128xf32>, vector<128x128xf32>, vector<8x128xf32> -> vector<8x128xf32>
    %c0_4 = arith.constant 0 : index
    %c0_5 = arith.constant 0 : index
    %4 = vector.load %arg8[%c0_4, %c0_5] : memref<1x128xf32, #tpu.memory_space<vmem>>, vector<1x128xf32>
    %5 = vector.broadcast %4 : vector<1x128xf32> to vector<8x128xf32>
    %6 = arith.addf %3, %5 : vector<8x128xf32>
    %c0_6 = arith.constant 0 : index
    %c0_7 = arith.constant 0 : index
    %c0_8 = arith.constant 0 : index
    %7 = vector.load %arg3[%c0_6, %c0_7, %c0_8] : memref<1x8x128xf32, #tpu.memory_space<vmem>>, vector<1x8x128xf32>
    %8 = vector.shape_cast %7 : vector<1x8x128xf32> to vector<8x128xf32>
    %c0_9 = arith.constant 0 : index
    %c0_10 = arith.constant 0 : index
    %9 = vector.load %arg5[%c0_9, %c0_10] : memref<128x128xf32, #tpu.memory_space<vmem>>, vector<128x128xf32>
    %cst_11 = arith.constant dense<0.000000e+00> : vector<8x128xf32>
    %10 = tpu.matmul %8, %9, %cst_11 {dimension_numbers = #tpu.dot_dimension_numbers<[1], [0], [0], [1], [0, 0, 1, 1], [], []>} : vector<8x128xf32>, vector<128x128xf32>, vector<8x128xf32> -> vector<8x128xf32>
    %c0_12 = arith.constant 0 : index
    %c0_13 = arith.constant 0 : index
    %11 = vector.load %arg9[%c0_12, %c0_13] : memref<1x128xf32, #tpu.memory_space<vmem>>, vector<1x128xf32>
    %12 = vector.broadcast %11 : vector<1x128xf32> to vector<8x128xf32>
    %13 = arith.addf %10, %12 : vector<8x128xf32>
    %c0_14 = arith.constant 0 : index
    %c0_15 = arith.constant 0 : index
    %14 = vector.load %arg6[%c0_14, %c0_15] : memref<128x128xf32, #tpu.memory_space<vmem>>, vector<128x128xf32>
    %cst_16 = arith.constant dense<0.000000e+00> : vector<8x128xf32>
    %15 = tpu.matmul %8, %14, %cst_16 {dimension_numbers = #tpu.dot_dimension_numbers<[1], [0], [0], [1], [0, 0, 1, 1], [], []>} : vector<8x128xf32>, vector<128x128xf32>, vector<8x128xf32> -> vector<8x128xf32>
    %c0_17 = arith.constant 0 : index
    %c0_18 = arith.constant 0 : index
    %16 = vector.load %arg10[%c0_17, %c0_18] : memref<1x128xf32, #tpu.memory_space<vmem>>, vector<1x128xf32>
    %17 = vector.broadcast %16 : vector<1x128xf32> to vector<8x128xf32>
    %18 = arith.addf %15, %17 : vector<8x128xf32>
    %cst_19 = arith.constant dense<0.000000e+00> : vector<8x8xf32>
    %19 = tpu.matmul %6, %13, %cst_19 {dimension_numbers = #tpu.dot_dimension_numbers<[1], [1], [0], [0], [0, 0, 1, 0], [], []>} : vector<8x128xf32>, vector<8x128xf32>, vector<8x8xf32> -> vector<8x8xf32>
    %cst_20 = arith.constant dense<0xFF800000> : vector<8xf32>
    %20 = vector.multi_reduction <maximumf>, %19, %cst_20 [1] : vector<8x8xf32> to vector<8xf32>
    %21 = vector.shape_cast %20 : vector<8xf32> to vector<8x1xf32>
    %22 = vector.broadcast %21 : vector<8x1xf32> to vector<8x8xf32>
    %23 = arith.subf %19, %22 : vector<8x8xf32>
    %24 = math.exp %23 : vector<8x8xf32>
    %cst_21 = arith.constant dense<0.000000e+00> : vector<8xf32>
    %25 = vector.multi_reduction <add>, %24, %cst_21 [1] : vector<8x8xf32> to vector<8xf32>
    %26 = vector.shape_cast %25 : vector<8xf32> to vector<8x1xf32>
    %cst_22 = arith.constant dense<0.000000e+00> : vector<8x128xf32>
    %27 = tpu.matmul %24, %18, %cst_22 {dimension_numbers = #tpu.dot_dimension_numbers<[1], [0], [0], [1], [0, 0, 1, 1], [], []>} : vector<8x8xf32>, vector<8x128xf32>, vector<8x128xf32> -> vector<8x128xf32>
    %28 = vector.broadcast %26 : vector<8x1xf32> to vector<8x128xf32>
    %29 = arith.divf %27, %28 : vector<8x128xf32>
    %c0_23 = arith.constant 0 : index
    %c0_24 = arith.constant 0 : index
    %30 = vector.load %arg7[%c0_23, %c0_24] : memref<128x128xf32, #tpu.memory_space<vmem>>, vector<128x128xf32>
    %cst_25 = arith.constant dense<0.000000e+00> : vector<8x128xf32>
    %31 = tpu.matmul %29, %30, %cst_25 {dimension_numbers = #tpu.dot_dimension_numbers<[1], [0], [0], [1], [0, 0, 1, 1], [], []>} : vector<8x128xf32>, vector<128x128xf32>, vector<8x128xf32> -> vector<8x128xf32>
    %c0_26 = arith.constant 0 : index
    %c0_27 = arith.constant 0 : index
    %32 = vector.load %arg11[%c0_26, %c0_27] : memref<1x128xf32, #tpu.memory_space<vmem>>, vector<1x128xf32>
    %33 = vector.broadcast %32 : vector<1x128xf32> to vector<8x128xf32>
    %34 = arith.addf %31, %33 : vector<8x128xf32>
    %c0_28 = arith.constant 0 : index
    %c0_29 = arith.constant 0 : index
    %c0_30 = arith.constant 0 : index
    %35 = vector.load %arg2[%c0_28, %c0_29, %c0_30] : memref<1x8x128xf32, #tpu.memory_space<vmem>>, vector<1x8x128xf32>
    %36 = vector.shape_cast %35 : vector<1x8x128xf32> to vector<8x128xf32>
    %37 = arith.addf %34, %36 : vector<8x128xf32>
    %c0_31 = arith.constant 0 : index
    %c0_32 = arith.constant 0 : index
    %c0_33 = arith.constant 0 : index
    %38 = vector.load %arg12[%c0_31, %c0_32, %c0_33] : memref<1x8x128xf32, #tpu.memory_space<vmem>>, vector<1x8x128xf32>
    %39 = vector.shape_cast %38 : vector<1x8x128xf32> to vector<8x128xf32>
    %40 = vector.shape_cast %37 : vector<8x128xf32> to vector<1x8x128xf32>
    tpu.vector_store %arg12[%c0_31, %c0_32, %c0_33], %40 {strides = array<i32>} : memref<1x8x128xf32, #tpu.memory_space<vmem>>, vector<1x8x128xf32>,
    return
  }
  func.func @transform_0(%arg0: i32, %arg1: i32) -> (i32, i32, i32) {
    %c0_i32 = arith.constant 0 : i32
    %c0_i32_0 = arith.constant 0 : i32
    return %arg0, %arg1, %c0_i32 : i32, i32, i32
  }
  func.func @transform_1(%arg0: i32, %arg1: i32) -> (i32, i32, i32) {
    %c0_i32 = arith.constant 0 : i32
    %c0_i32_0 = arith.constant 0 : i32
    %c0_i32_1 = arith.constant 0 : i32
    return %arg0, %c0_i32, %c0_i32_0 : i32, i32, i32
  }
  func.func @transform_2(%arg0: i32, %arg1: i32) -> (i32, i32) {
    %c0_i32 = arith.constant 0 : i32
    %c0_i32_0 = arith.constant 0 : i32
    %c0_i32_1 = arith.constant 0 : i32
    return %c0_i32, %c0_i32_0 : i32, i32
  }
  func.func @transform_3(%arg0: i32, %arg1: i32) -> (i32, i32) {
    %c0_i32 = arith.constant 0 : i32
    %c0_i32_0 = arith.constant 0 : i32
    %c0_i32_1 = arith.constant 0 : i32
    return %c0_i32, %c0_i32_0 : i32, i32
  }
  func.func @transform_4(%arg0: i32, %arg1: i32) -> (i32, i32) {
    %c0_i32 = arith.constant 0 : i32
    %c0_i32_0 = arith.constant 0 : i32
    %c0_i32_1 = arith.constant 0 : i32
    return %c0_i32, %c0_i32_0 : i32, i32
  }
  func.func @transform_5(%arg0: i32, %arg1: i32) -> (i32, i32) {
    %c0_i32 = arith.constant 0 : i32
    %c0_i32_0 = arith.constant 0 : i32
    %c0_i32_1 = arith.constant 0 : i32
    return %c0_i32, %c0_i32_0 : i32, i32
  }
  func.func @transform_6(%arg0: i32, %arg1: i32) -> (i32, i32) {
    %c0_i32 = arith.constant 0 : i32
    %c0_i32_0 = arith.constant 0 : i32
    %c0_i32_1 = arith.constant 0 : i32
    return %c0_i32, %c0_i32_0 : i32, i32
  }
  func.func @transform_7(%arg0: i32, %arg1: i32) -> (i32, i32) {
    %c0_i32 = arith.constant 0 : i32
    %c0_i32_0 = arith.constant 0 : i32
    %c0_i32_1 = arith.constant 0 : i32
    return %c0_i32, %c0_i32_0 : i32, i32
  }
  func.func @transform_8(%arg0: i32, %arg1: i32) -> (i32, i32) {
    %c0_i32 = arith.constant 0 : i32
    %c0_i32_0 = arith.constant 0 : i32
    %c0_i32_1 = arith.constant 0 : i32
    return %c0_i32, %c0_i32_0 : i32, i32
  }
  func.func @transform_9(%arg0: i32, %arg1: i32) -> (i32, i32) {
    %c0_i32 = arith.constant 0 : i32
    %c0_i32_0 = arith.constant 0 : i32
    %c0_i32_1 = arith.constant 0 : i32
    return %c0_i32, %c0_i32_0 : i32, i32
  }
  func.func @transform_10(%arg0: i32, %arg1: i32) -> (i32, i32, i32) {
    %c0_i32 = arith.constant 0 : i32
    %c0_i32_0 = arith.constant 0 : i32
    return %arg0, %arg1, %c0_i32 : i32, i32, i32
  }
}

</mosaic_0001>

<bundles_post_ra>
// kernel: tpu_custom_call.1
= control target key start
LH: loop header
LB: loop body
LE: loop exit
PB: predicated region body
PF: predicated region fallthrough
CT: control target
= control target key end

     0   :  { %s1582_s0 = inlined_call_operand.hbm [shape: f32[2,8,128], index: 0, kind: input, shape index: {}]   ;;  %s1583_s1 = inlined_call_operand.hbm [shape: f32[2,8,128], index: 1, kind: input, shape index: {}]   ;;  %s1584_s2 = inlined_call_operand.hbm [shape: f32[128,128], index: 2, kind: input, shape index: {}]   ;;  %s1585_s3 = inlined_call_operand.hbm [shape: f32[128,128], index: 3, kind: input, shape index: {}]   ;;  %s1586_s4 = inlined_call_operand.hbm [shape: f32[128,128], index: 4, kind: input, shape index: {}]   ;;  %s1587_s5 = inlined_call_operand.hbm [shape: f32[128,128], index: 5, kind: input, shape index: {}]   ;;  %s1588_s6 = inlined_call_operand.vmem [shape: f32[1,128], index: 6, kind: input, shape index: {}]   ;;  %s1589_s7 = inlined_call_operand.vmem [shape: f32[1,128], index: 7, kind: input, shape index: {}]   ;;  %s1590_s8 = inlined_call_operand.vmem [shape: f32[1,128], index: 8, kind: input, shape index: {}]   ;;  %s1591_s9 = inlined_call_operand.vmem [shape: f32[1,128], index: 9, kind: input, shape index: {}]   ;;  %s1592_s10 = inlined_call_operand.hbm [shape: f32[2,8,128], index: 10, kind: output, shape index: {}]  }
   0x1   :  { %1600 = sst [smem:[#allocation27_spill]] %s1584_s2 }
   0x2   :  { %1601 = sst [smem:[#allocation28_spill]] %s1585_s3 }
   0x3   :  { %1602 = sst [smem:[#allocation29_spill]] %s1586_s4 }
   0x4   :  { %1603 = sst [smem:[#allocation30_spill]] %s1587_s5 }
   0x5   :  { %15 = vsyncpa [#allocation3], 0 }
   0x6   :  { %17 = vsyncpa [#allocation3 + $0x1], 0 }
   0x7   :  { %18 = vsyncpa [#allocation6], 0 }
   0x8   :  { %20 = vsyncpa [#allocation6 + $0x1], 0 }
   0x9   :  { %21 = vsyncpa [#allocation9], 0 }
   0xa   :  { %22 = vsyncpa [#allocation12], 0 }
   0xb   :  { %23 = vsyncpa [#allocation4], 0 }
   0xc   :  { %25 = vsyncpa [#allocation4 + $0x1], 0  ;;  %s1373_s13 = smov 0   ;;  %s1375_s14 = smov 0  }
   0xd   :  { %s1377_s15 = smov 0   ;;  %s1379_s16 = smov 0  }
   0xe   :  { %s1381_s17 = smov 0   ;;  %s1383_s18 = smov 0  }
   0xf LB: > { %1604 = sst [smem:[#allocation20_spill]] %s1290_s13  ;;  %s1404_s19 = sadd.s32 4294967295, %s1310_s18   ;;  %s1310_s18 = sphi %s1383_s18, %s31_s18   ;;  %s1306_s17 = sphi %s1381_s17, %s1627_s17   ;;  %s1302_s16 = sphi %s1379_s16, %s1626_s16   ;;  %s1298_s15 = sphi %s1377_s15, %s1625_s15   ;;  %s1294_s14 = sphi %s1375_s14, %s1629_s14   ;;  %s1290_s13 = sphi %s1373_s13, %s1628_s13  }
  0x10   : > { %1605 = sst [smem:[#allocation21_spill]] %s1298_s15  ;;  %p891_p0 = scmp.ge.s32.totalorder %s1310_s18, 1 }
  0x11   : > { %1606 = sst [smem:[#allocation22_spill]] %s1306_s17  ;;  %p66_p1 = scmp.eq.s32.totalorder %s1404_s19, 0 }
  0x12   : > { %p298_p2 = scmp.lt.s32.totalorder %s1310_s18, 3  ;;  %s1607_s2 = sld [smem:[#allocation27_spill]] }
  0x13   : > { %s1312_s24 = smov [#allocation7]   ;;  %p896_p6 = scmp.ge.s32.totalorder %s1310_s18, 2 }
  0x14   : > { %p1412_p3 = pnand %p891_p0, %p298_p2  ;;  %s311_s25 = sshll.u32 %s1312_s24, 4  ;;  %s312_s25 = int_to_ptr.vmem [resolvable:$true] %s311_s25 }
  0x15   : > { %s1610_s3 = sld [smem:[#allocation28_spill]]  ;;  %s1313_s30 = smov 128  }
  0x16   : > { %p936_p4 = pneg %p1412_p3  ;;  %s1314_s11 = smov 8  }
  0x17   : > { %s1315_s12 = smov [#allocation8]   ;;  %s1611_s4 = sld [smem:[#allocation29_spill]] }
  0x18   : > { %s309_s22 = sshll.u32 %s1607_s2, 4  ;;  %p1420_p5 = pnand %p936_p4, %p66_p1  ;;  %s310_s22 = int_to_ptr.hbm [resolvable:$true] %s309_s22 }
  0x19   : > { %s325_s20 = sshll.u32 %s1315_s12, 4  ;;  %s1612_s5 = sld [smem:[#allocation30_spill]]  ;;  %s326_s20 = int_to_ptr.vmem [resolvable:$true] %s325_s20 }
  0x1a   : > { %939 = dma.hbm_to_vmem [thread:$0]  (!%p1420_p5), %s310_s22, 2048, %s312_s25, [#allocation6], %s1313_s30, %s1313_s30, %s1314_s11  }
  0x1b   : > { %s323_s29 = sshll.u32 %s1610_s3, 4  ;;  %s1316_s25 = smov [#allocation10]   ;;  %s324_s29 = int_to_ptr.hbm [resolvable:$true] %s323_s29 }
  0x1c   : > { %942 = dma.hbm_to_vmem [thread:$0]  (!%p1420_p5), %s324_s29, 2048, %s326_s20, [#allocation9], %s1313_s30, %s1313_s30, %s1314_s11  }
  0x1d   : > { %s337_s2 = sshll.u32 %s1611_s4, 4  ;;  %s339_s3 = sshll.u32 %s1316_s25, 4  ;;  %s338_s2 = int_to_ptr.hbm [resolvable:$true] %s337_s2  ;;  %s340_s3 = int_to_ptr.vmem [resolvable:$true] %s339_s3 }
  0x1e   : > { %945 = dma.hbm_to_vmem [thread:$0]  (!%p1420_p5), %s338_s2, 2048, %s340_s3, [#allocation9], %s1313_s30, %s1313_s30, %s1314_s11  }
  0x1f   : > { %s351_s22 = sshll.u32 %s1612_s5, 4  ;;  %s1317_s12 = smov [#allocation11]   ;;  %s352_s22 = int_to_ptr.hbm [resolvable:$true] %s351_s22 }
  0x20   : > { %s353_s21 = sshll.u32 %s1317_s12, 4  ;;  %s890_s29 = sadd.s32 4294967294, %s1310_s18   ;;  %s354_s21 = int_to_ptr.vmem [resolvable:$true] %s353_s21 }
  0x21   : > { %948 = dma.hbm_to_vmem [thread:$0]  (!%p1420_p5), %s352_s22, 2048, %s354_s21, [#allocation12], %s1313_s30, %s1313_s30, %s1314_s11  }
  0x22   : > { %s43_s20 = sadd.s32 1, %s1306_s17  ;;  %s52_s24 = sadd.s32 1, %s1298_s15 }
  0x23   : > { %p45_p7 = scmp.ge.s32.totalorder %s43_s20, 2  ;;  %p59_p8 = scmp.ne.s32.totalorder %s1298_s15, %s1294_s14 }
  0x24   : > { %p60_p9 = scmp.eq.s32.totalorder %s1310_s18, 0  ;;  %p65_p11 = scmp.ne.s32.totalorder %s1294_s14, %s1290_s13 }
  0x25   : > { %s1631_s20 = smov (%p45_p7, %s43_s20), 0  ;;  %p285_p12 = scmp.eq.s32.totalorder %s1404_s19, 1 }
  0x26   : > { %1613 = sst [smem:[#allocation23_spill]] %s1631_s20  ;;  %p1450_p10 = por %p60_p9, %p59_p8 }
  0x27   : > { %s47_s3 = ssub.s32 %s1306_s17, %s1631_s20  ;;  %p1461_p0 = por %p66_p1, %p65_p11 }
  0x28   : > { %p50_p13 = scmp.eq.s32.totalorder %s47_s3, 0  ;;  %p1465_p2 = por %p285_p12, %p59_p8 }
  0x29   : > { %p291_p4 = scmp.eq.s32.totalorder %s890_s29, 1  ;;  %p964_p7 = scmp.lt.s32.totalorder %s1310_s18, 2 }
  0x2a   : > { %s1616_s30 = scalar_select %p1465_p2, 1, 0 }
  0x2b   : > { %s1470_s11 = scalar_select %p50_p13, %s1298_s15, %s52_s24  }
  0x2c   : > { %1617 = sst [smem:[#allocation24_spill]] %s1616_s30  ;;  %p1472_p5 = por %p291_p4, %p65_p11 }
  0x2d   : > { %1618 = sst [smem:[#allocation25_spill]] %s1470_s11  ;;  %s379_s28 = sand.u32 1, %s1298_s15  }
  0x2e   : > { %s1619_s27 = scalar_select %p1472_p5, 1, 0 }
  0x2f   : > { %s898_s22 = sshll.u32 %s1306_s17, 3  ;;  %s897_s25 = sshll.u32 %s379_s28, 3 }
  0x30   : > { %1620 = sst [smem:[#allocation26_spill]] %s1619_s27  ;;  %s388_s3 = scalar_lea.hbm %s1582_s0, %s898_s22 }
  0x31   : > { %s390_s4 = sshll.u32 %s388_s3, 4  ;;  %s383_s5 = scalar_lea.vmem [#allocation2], %s897_s25  ;;  %s391_s4 = int_to_ptr.hbm [resolvable:$true] %s390_s4 }
  0x32   : > { %s392_s20 = sshll.u32 %s383_s5, 4  ;;  %p950_p8 = pnand %p964_p7, %p1450_p10  ;;  %s393_s20 = int_to_ptr.vmem [resolvable:$true] %s392_s20 }
  0x33   : > { %s407_s11 = scalar_lea.hbm %s1583_s1, %s898_s22  ;;  %s399_s27 = sand.u32 1, %s1310_s18  }
  0x34   : > { %s380_s13 = scalar_lea.sflag [#allocation3], %s379_s28  ;;  %s409_s17 = sshll.u32 %s407_s11, 4  ;;  %s410_s17 = int_to_ptr.hbm [resolvable:$true] %s409_s17 }
  0x35   : > { %952 = dma.hbm_to_vmem [thread:$0]  (!%p950_p8), %s391_s4, 128, %s393_s20, %s380_s13  }
  0x36   : > { %s403_s15 = scalar_lea.vmem [#allocation5], %s897_s25  ;;  %s400_s12 = scalar_lea.sflag [#allocation6], %s399_s27 }
  0x37   : > { %s411_s30 = sshll.u32 %s403_s15, 4  ;;  %420 = sbr.rel (%p1412_p3) target bundleno = 762 (0x2fa), region = 60  ;;  %s412_s30 = int_to_ptr.vmem [resolvable:$true] %s411_s30 }
  0x38   : > { %955 = dma.hbm_to_vmem [thread:$0]  (!%p950_p8), %s410_s17, 128, %s412_s30, %s400_s12  }
  0x39   : > { %s1491_s5 = sand.u32 (!%p1412_p3), 1, %s1294_s14  }
  0x3a   : > { %s1494_s2 = sshll.u32 (!%p1412_p3), %s1491_s5, 3  ;;  %s423_s4 = scalar_lea.sflag (!%p1412_p3), [#allocation3], %s1491_s5 }
  0x3b   : > { %s426_s13 = scalar_lea.vmem (!%p1412_p3), [#allocation2], %s1494_s2 }
  0x3c   : > { %1265 = dma.done.wait (%p1461_p0), %s423_s4, 128  }
  0x3d   : > { %1267 = vsyncadd (%p1461_p0), %s423_s4, 4294967168  ;;  %s432_s15 = sand.u32 1, %s1404_s19   ;;  %s436_s23 = scalar_lea.vmem [#allocation5], %s1494_s2 }
  0x3e   : > { %s433_s17 = scalar_lea.sflag [#allocation6], %s432_s15 }
  0x3f   : > { %1269 = dma.done.wait (%p1461_p0), %s433_s17, 128  }
  0x40   : > { %1271 = vsyncadd (%p1461_p0), %s433_s17, 4294967168 }
  0x41   : > { %1273 = dma.done.wait (%p66_p1), [#allocation6], 2048  }
  0x42   : > { %1275 = vsyncadd (%p66_p1), [#allocation6], 4294965248 }
  0x43   : > { %1277 = dma.done.wait (%p66_p1), [#allocation9], 4096  }
  0x44   : > { %1279 = vsyncadd (%p66_p1), [#allocation9], 4294963200 }
  0x45   : > { %1281 = dma.done.wait (%p66_p1), [#allocation12], 2048  }
  0x46   : > { %1283 = vsyncadd (%p66_p1), [#allocation12], 4294965248  ;;  %v556_v0 = vld [vmem:[#allocation8 + $0x78] sm:$0xff]  ;;  %v555_v1 = vld [vmem:[#allocation8 + $0x70] sm:$0xff]  ;;  %vm641_vm0 = vcmask 64512   ;;  %s911_s28 = sshll.u32 %s1302_s16, 3 }
  0x47   : > { %v515_v2 = vld [vmem:[#allocation7 + $0x78] sm:$0xff]  ;;  %561 = vmatpush.msra.mxu1 %v556_v0  ;;  %v514_v3 = vld [vmem:[#allocation7 + $0x70] sm:$0xff]  ;;  %v554_v4 = vld [vmem:[#allocation8 + $0x68] sm:$0xff]  ;;  %s743_s24 = scalar_lea.hbm %s1592_s10, %s911_s28  ;;  %s498_s12 = scalar_lea.vmem [#allocation13], %s1494_s2 }
  0x48   : > { %520 = vmatpush.msra.mxu0 %v515_v2  ;;  %v513_v5 = vld [vmem:[#allocation7 + $0x68] sm:$0xff]  ;;  %v553_v6 = vld [vmem:[#allocation8 + $0x60] sm:$0xff]  ;;  %v552_v8 = vld [vmem:[#allocation8 + $0x58] sm:$0xff]  ;;  %s745_s4 = sshll.u32 %s498_s12, 4  ;;  %s732_s16 = scalar_lea.sflag [#allocation4], %s1491_s5  ;;  %s746_s4 = int_to_ptr.vmem [resolvable:$true] %s745_s4 }
  0x49   : > { %562 = vmatpush.msra.mxu1 %v555_v1  ;;  %v512_v7 = vld [vmem:[#allocation7 + $0x60] sm:$0xff]  ;;  %v511_v9 = vld [vmem:[#allocation7 + $0x58] sm:$0xff]  ;;  %v551_v10 = vld [vmem:[#allocation8 + $0x50] sm:$0xff]  ;;  %s1232_s2 = scalar_lea.hbm %s1592_s10, 16 }
  0x4a   : > { %521 = vmatpush.msra.mxu0 %v514_v3  ;;  %v510_v11 = vld [vmem:[#allocation7 + $0x50] sm:$0xff]  ;;  %v550_v12 = vld [vmem:[#allocation8 + $0x48] sm:$0xff]  ;;  %v549_v14 = vld [vmem:[#allocation8 + $0x40] sm:$0xff] }
  0x4b   : > { %563 = vmatpush.msra.mxu1 %v554_v4  ;;  %v509_v13 = vld [vmem:[#allocation7 + $0x48] sm:$0xff]  ;;  %v508_v15 = vld [vmem:[#allocation7 + $0x40] sm:$0xff]  ;;  %v548_v16 = vld [vmem:[#allocation8 + $0x38] sm:$0xff] }
  0x4c   : > { %522 = vmatpush.msra.mxu0 %v513_v5  ;;  %v507_v17 = vld [vmem:[#allocation7 + $0x38] sm:$0xff]  ;;  %v547_v18 = vld [vmem:[#allocation8 + $0x30] sm:$0xff]  ;;  %v546_v20 = vld [vmem:[#allocation8 + $0x28] sm:$0xff] }
  0x4d   : > { %564 = vmatpush.msra.mxu1 %v553_v6  ;;  %v506_v19 = vld [vmem:[#allocation7 + $0x30] sm:$0xff]  ;;  %v505_v21 = vld [vmem:[#allocation7 + $0x28] sm:$0xff]  ;;  %v545_v22 = vld [vmem:[#allocation8 + $0x20] sm:$0xff] }
  0x4e   : > { %523 = vmatpush.msra.mxu0 %v512_v7  ;;  %v504_v23 = vld [vmem:[#allocation7 + $0x20] sm:$0xff]  ;;  %v544_v24 = vld [vmem:[#allocation8 + $0x18] sm:$0xff]  ;;  %v543_v26 = vld [vmem:[#allocation8 + $0x10] sm:$0xff] }
  0x4f   : > { %565 = vmatpush.msra.mxu1 %v552_v8  ;;  %v503_v25 = vld [vmem:[#allocation7 + $0x18] sm:$0xff]  ;;  %v502_v27 = vld [vmem:[#allocation7 + $0x10] sm:$0xff]  ;;  %v542_v28 = vld [vmem:[#allocation8 + $0x8] sm:$0xff] }
  0x50   : > { %524 = vmatpush.msra.mxu0 %v511_v9  ;;  %v501_v29 = vld [vmem:[#allocation7 + $0x8] sm:$0xff]  ;;  %v541_v30 = vld [vmem:[#allocation8] sm:$0xff]  ;;  %v540_v32 = vld [vmem:[%s436_s23] sm:$0xff] }
  0x51   : > { %566 = vmatpush.msra.mxu1 %v551_v10  ;;  %v500_v31 = vld [vmem:[#allocation7] sm:$0xff]  ;;  %v596_v34 = vld [vmem:[#allocation10 + $0x78] sm:$0xff]  ;;  %v595_v35 = vld [vmem:[#allocation10 + $0x70] sm:$0xff] }
  0x52   : > { %525 = vmatpush.msra.mxu0 %v510_v11  ;;  %v1524_v33 = vld [vmem:[%s426_s13] sm:$0xff]  ;;  %601 = vmatpush.msra.mxu2 %v596_v34  ;;  %v592_v38 = vld [vmem:[#allocation10 + $0x58] sm:$0xff]  ;;  %v591_v39 = vld [vmem:[#allocation10 + $0x50] sm:$0xff]  ;;  %s747_s13 = sshll.u32 %s743_s24, 4  ;;  %s748_s13 = int_to_ptr.hbm [resolvable:$true] %s747_s13 }
  0x53   : > { %567 = vmatpush.msra.mxu1 %v550_v12  ;;  %v594_v36 = vld [vmem:[#allocation10 + $0x68] sm:$0xff]  ;;  %v593_v37 = vld [vmem:[#allocation10 + $0x60] sm:$0xff]  ;;  %v588_v42 = vld [vmem:[#allocation10 + $0x38] sm:$0xff]  ;;  %s1226_s15 = sshra.s32 %s748_s13, 4  ;;  %s1227_s15 = int_to_ptr.hbm [resolvable:$true] %s1226_s15 }
  0x54   : > { %526 = vmatpush.msra.mxu0 %v509_v13  ;;  %602 = vmatpush.msra.mxu2 %v595_v35  ;;  %v590_v40 = vld [vmem:[#allocation10 + $0x48] sm:$0xff]  ;;  %v589_v41 = vld [vmem:[#allocation10 + $0x40] sm:$0xff]  ;;  %v587_v43 = vld [vmem:[#allocation10 + $0x30] sm:$0xff]  ;;  %s1228_s17 = scalar_lea.hbm %s1227_s15, 8  ;;  %p1233_p10 = scmp.lt.s32.totalorder %s1227_s15, %s1592_s10 }
  0x55   : > { %568 = vmatpush.msra.mxu1 %v549_v14  ;;  %v586_v44 = vld [vmem:[#allocation10 + $0x28] sm:$0xff]  ;;  %v585_v45 = vld [vmem:[#allocation10 + $0x20] sm:$0xff]  ;;  %v584_v46 = vld [vmem:[#allocation10 + $0x18] sm:$0xff]  ;;  %p1229_p1 = scmp.ne.s32.totalorder %s1227_s15, %s1228_s17  ;;  %p1234_p11 = scmp.lt.s32.totalorder %s1232_s2, %s1228_s17 }
  0x56   : > { %527 = vmatpush.msra.mxu0 %v508_v15  ;;  %603 = vmatpush.msra.mxu2 %v594_v36  ;;  %v1024_v47 = vld [vmem:[%s1589_s7] ss:$0 sm:$0xff]  ;;  %v583_v49 = vld [vmem:[#allocation10 + $0x10] sm:$0xff]  ;;  %v582_v52 = vld [vmem:[#allocation10 + $0x8] sm:$0xff] }
  0x57   : > { %569 = vmatpush.msra.mxu1 %v548_v16  ;;  %v1025_v48 = vld [vmem:[%s1588_s6] ss:$0 sm:$0xff]  ;;  %v704_v61 = vld [vmem:[#allocation11 + $0x78] sm:$0xff]  ;;  %v703_v62 = vld [vmem:[#allocation11 + $0x70] sm:$0xff]  ;;  %p1230_p3 = pnand %p1229_p1, %p1465_p2  ;;  %p1235_p12 = por %p1234_p11, %p1233_p10 }
  0x58   : > { %528 = vmatpush.msra.mxu0 %v507_v17  ;;  %604 = vmatpush.msra.mxu2 %v593_v37  ;;  %v581_v55 = vld [vmem:[#allocation10] sm:$0xff]  ;;  %v702_v63 = vld [vmem:[#allocation11 + $0x68] sm:$0xff]  ;;  %v700_v1 = vld [vmem:[#allocation11 + $0x58] sm:$0xff] }
  0x59   : > { %570 = vmatpush.msra.mxu1 %v547_v18  ;;  %v1026_v59 = vld [vmem:[%s1590_s8] ss:$0 sm:$0xff]  ;;  %v699_v2 = vld [vmem:[#allocation11 + $0x50] sm:$0xff]  ;;  %v698_v8 = vld [vmem:[#allocation11 + $0x48] sm:$0xff]  ;;  %p1231_p9 = pneg %p1230_p3 }
  0x5a   : > { %529 = vmatpush.msra.mxu0 %v506_v19  ;;  %605 = vmatpush.msra.mxu2 %v592_v38  ;;  %v701_v0 = vld [vmem:[#allocation11 + $0x60] sm:$0xff]  ;;  %v696_v10 = vld [vmem:[#allocation11 + $0x38] sm:$0xff]  ;;  %v695_v11 = vld [vmem:[#allocation11 + $0x30] sm:$0xff] }
  0x5b   : > { %571 = vmatpush.msra.mxu1 %v546_v20  ;;  %v697_v9 = vld [vmem:[#allocation11 + $0x40] sm:$0xff]  ;;  %v694_v12 = vld [vmem:[#allocation11 + $0x28] sm:$0xff]  ;;  %v692_v14 = vld [vmem:[#allocation11 + $0x18] sm:$0xff]  ;;  %p1236_p13 = pnand %p1235_p12, %p1231_p9 }
  0x5c   : > { %530 = vmatpush.msra.mxu0 %v505_v21  ;;  %606 = vmatpush.msra.mxu2 %v591_v39  ;;  %v693_v13 = vld [vmem:[#allocation11 + $0x20] sm:$0xff]  ;;  %v691_v15 = vld [vmem:[#allocation11 + $0x10] sm:$0xff]  ;;  %v690_v16 = vld [vmem:[#allocation11 + $0x8] sm:$0xff] }
  0x5d   : > { %572 = vmatpush.msra.mxu1 %v545_v22  ;;  %v689_v17 = vld [vmem:[#allocation11] sm:$0xff] }
  0x5e   : > { %531 = vmatpush.msra.mxu0 %v504_v23  ;;  %607 = vmatpush.msra.mxu2 %v590_v40 }
  0x5f   : > { %573 = vmatpush.msra.mxu1 %v544_v24 }
  0x60   : > { %532 = vmatpush.msra.mxu0 %v503_v25  ;;  %608 = vmatpush.msra.mxu2 %v589_v41 }
  0x61   : > { %574 = vmatpush.msra.mxu1 %v543_v26 }
  0x62   : > { %533 = vmatpush.msra.mxu0 %v502_v27  ;;  %609 = vmatpush.msra.mxu2 %v588_v42 }
  0x63   : > { %575 = vmatpush.msra.mxu1 %v542_v28 }
  0x64   : > { %534 = vmatpush.msra.mxu0 %v501_v29  ;;  %610 = vmatpush.msra.mxu2 %v587_v43 }
  0x65   : > { %576 = vmatpush.msra.mxu1 %v541_v30 }
  0x66   : > { %535 = vmatpush.msra.mxu0 %v500_v31  ;;  %577 = vmatmul.f32.vlgmr.msra.gmra.mxu1 %v540_v32  ;;  %v1027_v31 = vld [vmem:[%s1591_s9] ss:$0 sm:$0xff] }
  0x67   : > { %536 = vmatmul.f32.vlgmr.msra.gmra.mxu0 %v1524_v33  ;;  %611 = vmatpush.msra.mxu2 %v586_v44 }
  0x69   : > { %612 = vmatpush.msra.mxu2 %v585_v45 }
  0x6b   : > { %613 = vmatpush.msra.mxu2 %v584_v46 }
  0x6d   : > { %614 = vmatpush.msra.mxu2 %v583_v49 }
  0x6f   : > { %615 = vmatpush.msra.mxu2 %v582_v52 }
  0x71   : > { %616 = vmatpush.msra.mxu2 %v581_v55 }
  0x72   : > { %617 = vmatmul.f32.vlgmr.msra.gmra.mxu2 %v540_v32 }
  0xe3   : > { %v578_v50 = vpop.f32.mrf.mxu1 }
  0xe4   : > { %v537_v51 = vpop.f32.mrf.mxu0  ;;  %v579_v53 = vadd.f32 %v1024_v47, %v578_v50 }
  0xe5   : > { %v538_v54 = vadd.f32 %v1025_v48, %v537_v51 }
  0xe6   : > { %636 = vmatpush.xpose.msrb.mxu0 %v579_v53 }
  0xe9   : > { %637 = vmatmul.f32.vlgmr.msrb.gmra.mxu0 %v538_v54 }
  0xf5   : > { %v618_v58 = vpop.f32.mrf.mxu2 }
  0xf6   : > { %v619_v60 = vadd.f32 %v1026_v59, %v618_v58 }
  0xf8   : > { %669 = vmatpush.msra.mxu3 %v619_v60 }
  0xfa   : > { %709 = vmatpush.msrb.mxu3 %v704_v61 }
  0xfc   : > { %710 = vmatpush.msrb.mxu3 %v703_v62 }
  0xfe   : > { %711 = vmatpush.msrb.mxu3 %v702_v63 }
 0x100   : > { %712 = vmatpush.msrb.mxu3 %v701_v0 }
 0x102   : > { %713 = vmatpush.msrb.mxu3 %v700_v1 }
 0x104   : > { %714 = vmatpush.msrb.mxu3 %v699_v2 }
 0x106   : > { %715 = vmatpush.msrb.mxu3 %v698_v8 }
 0x108   : > { %716 = vmatpush.msrb.mxu3 %v697_v9 }
 0x10a   : > { %717 = vmatpush.msrb.mxu3 %v696_v10 }
 0x10c   : > { %718 = vmatpush.msrb.mxu3 %v695_v11 }
 0x10e   : > { %719 = vmatpush.msrb.mxu3 %v694_v12 }
 0x110   : > { %720 = vmatpush.msrb.mxu3 %v693_v13 }
 0x112   : > { %721 = vmatpush.msrb.mxu3 %v692_v14 }
 0x114   : > { %722 = vmatpush.msrb.mxu3 %v691_v15 }
 0x116   : > { %723 = vmatpush.msrb.mxu3 %v690_v16 }
 0x118   : > { %724 = vmatpush.msrb.mxu3 %v689_v17 }
 0x166   : > { %v638_v56 = vpop.f32.mrf.mxu0 }
 0x167   : > { %v642_v57 = vsel %vm641_vm0, %v638_v56, -inf }
 0x168   : > { %643 = vmax.xlane.f32.xlu0 %v642_v57 }
 0x1db   : > { %v644_v3 = vpop.xlane.xlu0 %643 }
 0x1dc   : > { %v645_v4 = vsub.f32 %v638_v56, %v644_v3 }
 0x1de   : > { %v646_v5 = vmul.f32 1.442695, %v645_v4 }
 0x1e0   : > { %1028 = vpow2.f32 %v646_v5 }
 0x1e6   : > { %v1029_v6 = vpop.eup %1028 }
 0x1e7   : > { %909 = vmatmul.msk.f32.vlgmr.msra.gmra.mxu3 %vm641_vm0, %v1029_v6  ;;  %v648_v7 = vsel %vm641_vm0, %v1029_v6, 0.0 }
 0x1e8   : > { %649 = vadd.xlane.f32.xlu0 %v648_v7 }
 0x25b   : > { %v650_v18 = vpop.xlane.xlu0 %649 }
 0x25c   : > { %1030 = vrcp.f32 %v650_v18  ;;  %v685_v22 = vand.u32 2147483648, %v650_v18  ;;  %v683_v24 = vand.u32 2147483647, %v650_v18  ;;  %vm679_vm2 = vweird.f32 %v650_v18 }
 0x25e   : > { %v686_v26 = vor.u32 1.1754944e-38, %v685_v22  ;;  %vm684_vm4 = vcmp.eq.f32.partialorder %v683_v24, 8.507059e+37 }
 0x262   : > { %v1031_v19 = vpop.eup %1030 }
 0x263   : > { %v675_v20 = vmul.f32 %v1031_v19, %v650_v18  ;;  %vm680_vm1 = vweird.f32 %v1031_v19 }
 0x264   : > { %vm681_vm3 = vmor %vm679_vm2, %vm680_vm1 }
 0x265   : > { %v676_v21 = vsub.f32 1.0, %v675_v20 }
 0x267   : > { %v677_v23 = vmul.f32 %v1031_v19, %v676_v21 }
 0x269   : > { %v678_v25 = vadd.f32 %v1031_v19, %v677_v23 }
 0x26a   : > { %v671_v28 = vpop.f32.mrf.mxu3 }
 0x26b   : > { %v682_v27 = vsel %vm681_vm3, %v1031_v19, %v678_v25 }
 0x26c   : > { %v687_v29 = vsel %vm684_vm4, %v686_v26, %v682_v27 }
 0x26d   : > { %v688_v30 = vmul.f32 %v687_v29, %v671_v28 }
 0x26f   : > { %725 = vmatmul.f32.vlgmr.msrb.gmra.mxu3 %v688_v30 }
 0x2f2   : > { %v726_v32 = vpop.f32.mrf.mxu3 }
 0x2f3   : > { %v727_v34 = vadd.f32 %v1027_v31, %v726_v32 }
 0x2f5   : > { %v729_v35 = vadd.f32 %v727_v34, %v1524_v33 }
 0x2f7   : > { %730 = vst [vmem:[%s498_s12] sm:$0xff] %v729_v35 }
 0x2f8   : > { %1239 = shalt.err (!%p1236_p13)
}
 0x2f9   : > { %934 = dma.vmem_to_hbm [thread:$0]  (%p1465_p2), %s746_s4, 128, %s748_s13, %s732_s16  }
 0x2fa PF: > { %s1622_s5 = sld [smem:[#allocation20_spill]]  ;;  %p957_p0 = pnand %p896_p6, %p1472_p5 }
 0x2fc   : > { %p958_p4 = pneg %p957_p0 }
 0x300   : > { %s759_s11 = sand.u32 1, %s1622_s5  }
 0x301   : > { %s760_s27 = scalar_lea.sflag [#allocation4], %s759_s11 }
 0x302   : > { %1285 = dma.done.wait (%p958_p4), %s760_s27, 128  }
 0x303   : > { %1287 = vsyncadd (%p958_p4), %s760_s27, 4294967168  ;;  %s31_s18 = sadd.s32 1, %s1310_s18   ;;  %s1624_s28 = sld [smem:[#allocation21_spill]] }
 0x304   : > { %p28_p7 = scmp.ge.s32.totalorder %s31_s18, 4   ;;  %s1625_s15 = sld [smem:[#allocation25_spill]] }
 0x305   : > { %s1626_s16 = sld [smem:[#allocation22_spill]]  ;;  %s1628_s13 = smov %s1294_s14 }
 0x306   : > { %s1627_s17 = sld [smem:[#allocation23_spill]]  ;;  %30 = sbr.rel (!%p28_p7) target bundleno = 15 (0xf), region = 134 }
 0x309   : > { %s1629_s14 = smov %s1624_s28 }
 0x30b   :  { %766 = vsyncpa [#allocation3], 1 }
 0x30c   :  { %768 = vsyncpa [#allocation3 + $0x1], 1 }
 0x30d   :  { %769 = vsyncpa [#allocation6], 1 }
 0x30e   :  { %771 = vsyncpa [#allocation6 + $0x1], 1 }
 0x30f   :  { %772 = vsyncpa [#allocation9], 1 }
 0x310   :  { %773 = vsyncpa [#allocation12], 1 }
 0x311   :  { %774 = vsyncpa [#allocation4], 1 }
 0x312   :  { %776 = vsyncpa [#allocation4 + $0x1], 1 }

// kernel: tpu_custom_call.1
= control target key start
LH: loop header
LB: loop body
LE: loop exit
PB: predicated region body
PF: predicated region fallthrough
CT: control target
= control target key end

     0   :  { %s1582_s0 = inlined_call_operand.hbm [shape: f32[2,8,128], index: 0, kind: input, shape index: {}]   ;;  %s1583_s1 = inlined_call_operand.hbm [shape: f32[2,8,128], index: 1, kind: input, shape index: {}]   ;;  %s1584_s2 = inlined_call_operand.hbm [shape: f32[128,128], index: 2, kind: input, shape index: {}]   ;;  %s1585_s3 = inlined_call_operand.hbm [shape: f32[128,128], index: 3, kind: input, shape index: {}]   ;;  %s1586_s4 = inlined_call_operand.hbm [shape: f32[128,128], index: 4, kind: input, shape index: {}]   ;;  %s1587_s5 = inlined_call_operand.hbm [shape: f32[128,128], index: 5, kind: input, shape index: {}]   ;;  %s1588_s6 = inlined_call_operand.vmem [shape: f32[1,128], index: 6, kind: input, shape index: {}]   ;;  %s1589_s7 = inlined_call_operand.vmem [shape: f32[1,128], index: 7, kind: input, shape index: {}]   ;;  %s1590_s8 = inlined_call_operand.vmem [shape: f32[1,128], index: 8, kind: input, shape index: {}]   ;;  %s1591_s9 = inlined_call_operand.vmem [shape: f32[1,128], index: 9, kind: input, shape index: {}]   ;;  %s1592_s10 = inlined_call_operand.hbm [shape: f32[2,8,128], index: 10, kind: output, shape index: {}]  }
   0x1   :  { %1600 = sst [smem:[#allocation27_spill]] %s1584_s2 }
   0x2   :  { %1601 = sst [smem:[#allocation28_spill]] %s1585_s3 }
   0x3   :  { %1602 = sst [smem:[#allocation29_spill]] %s1586_s4 }
   0x4   :  { %1603 = sst [smem:[#allocation30_spill]] %s1587_s5 }
   0x5   :  { %15 = vsyncpa [#allocation3], 0 }
   0x6   :  { %17 = vsyncpa [#allocation3 + $0x1], 0 }
   0x7   :  { %18 = vsyncpa [#allocation6], 0 }
   0x8   :  { %20 = vsyncpa [#allocation6 + $0x1], 0 }
   0x9   :  { %21 = vsyncpa [#allocation9], 0 }
   0xa   :  { %22 = vsyncpa [#allocation12], 0 }
   0xb   :  { %23 = vsyncpa [#allocation4], 0 }
   0xc   :  { %25 = vsyncpa [#allocation4 + $0x1], 0  ;;  %s1373_s13 = smov 0   ;;  %s1375_s14 = smov 0  }
   0xd   :  { %s1377_s15 = smov 0   ;;  %s1379_s16 = smov 0  }
   0xe   :  { %s1381_s17 = smov 0   ;;  %s1383_s18 = smov 0  }
   0xf LB: > { %1604 = sst [smem:[#allocation20_spill]] %s1290_s13  ;;  %s1404_s19 = sadd.s32 4294967295, %s1310_s18   ;;  %s1310_s18 = sphi %s1383_s18, %s31_s18   ;;  %s1306_s17 = sphi %s1381_s17, %s1627_s17   ;;  %s1302_s16 = sphi %s1379_s16, %s1626_s16   ;;  %s1298_s15 = sphi %s1377_s15, %s1625_s15   ;;  %s1294_s14 = sphi %s1375_s14, %s1629_s14   ;;  %s1290_s13 = sphi %s1373_s13, %s1628_s13  }
  0x10   : > { %1605 = sst [smem:[#allocation21_spill]] %s1298_s15  ;;  %p891_p0 = scmp.ge.s32.totalorder %s1310_s18, 1 }
  0x11   : > { %1606 = sst [smem:[#allocation22_spill]] %s1306_s17  ;;  %p66_p1 = scmp.eq.s32.totalorder %s1404_s19, 0 }
  0x12   : > { %p298_p2 = scmp.lt.s32.totalorder %s1310_s18, 3  ;;  %s1607_s2 = sld [smem:[#allocation27_spill]] }
  0x13   : > { %s1312_s24 = smov [#allocation7]   ;;  %p896_p6 = scmp.ge.s32.totalorder %s1310_s18, 2 }
  0x14   : > { %p1412_p3 = pnand %p891_p0, %p298_p2  ;;  %s311_s25 = sshll.u32 %s1312_s24, 4  ;;  %s312_s25 = int_to_ptr.vmem [resolvable:$true] %s311_s25 }
  0x15   : > { %s1610_s3 = sld [smem:[#allocation28_spill]]  ;;  %s1313_s30 = smov 128  }
  0x16   : > { %p936_p4 = pneg %p1412_p3  ;;  %s1314_s11 = smov 8  }
  0x17   : > { %s1315_s12 = smov [#allocation8]   ;;  %s1611_s4 = sld [smem:[#allocation29_spill]] }
  0x18   : > { %s309_s22 = sshll.u32 %s1607_s2, 4  ;;  %p1420_p5 = pnand %p936_p4, %p66_p1  ;;  %s310_s22 = int_to_ptr.hbm [resolvable:$true] %s309_s22 }
  0x19   : > { %s325_s20 = sshll.u32 %s1315_s12, 4  ;;  %s1612_s5 = sld [smem:[#allocation30_spill]]  ;;  %s326_s20 = int_to_ptr.vmem [resolvable:$true] %s325_s20 }
  0x1a   : > { %939 = dma.hbm_to_vmem [thread:$0]  (!%p1420_p5), %s310_s22, 2048, %s312_s25, [#allocation6], %s1313_s30, %s1313_s30, %s1314_s11  }
  0x1b   : > { %s323_s29 = sshll.u32 %s1610_s3, 4  ;;  %s1316_s25 = smov [#allocation10]   ;;  %s324_s29 = int_to_ptr.hbm [resolvable:$true] %s323_s29 }
  0x1c   : > { %942 = dma.hbm_to_vmem [thread:$0]  (!%p1420_p5), %s324_s29, 2048, %s326_s20, [#allocation9], %s1313_s30, %s1313_s30, %s1314_s11  }
  0x1d   : > { %s337_s2 = sshll.u32 %s1611_s4, 4  ;;  %s339_s3 = sshll.u32 %s1316_s25, 4  ;;  %s338_s2 = int_to_ptr.hbm [resolvable:$true] %s337_s2  ;;  %s340_s3 = int_to_ptr.vmem [resolvable:$true] %s339_s3 }
  0x1e   : > { %945 = dma.hbm_to_vmem [thread:$0]  (!%p1420_p5), %s338_s2, 2048, %s340_s3, [#allocation9], %s1313_s30, %s1313_s30, %s1314_s11  }
  0x1f   : > { %s351_s22 = sshll.u32 %s1612_s5, 4  ;;  %s1317_s12 = smov [#allocation11]   ;;  %s352_s22 = int_to_ptr.hbm [resolvable:$true] %s351_s22 }
  0x20   : > { %s353_s21 = sshll.u32 %s1317_s12, 4  ;;  %s890_s29 = sadd.s32 4294967294, %s1310_s18   ;;  %s354_s21 = int_to_ptr.vmem [resolvable:$true] %s353_s21 }
  0x21   : > { %948 = dma.hbm_to_vmem [thread:$0]  (!%p1420_p5), %s352_s22, 2048, %s354_s21, [#allocation12], %s1313_s30, %s1313_s30, %s1314_s11  }
  0x22   : > { %s43_s20 = sadd.s32 1, %s1306_s17  ;;  %s52_s24 = sadd.s32 1, %s1298_s15 }
  0x23   : > { %p45_p7 = scmp.ge.s32.totalorder %s43_s20, 2  ;;  %p59_p8 = scmp.ne.s32.totalorder %s1298_s15, %s1294_s14 }
  0x24   : > { %p60_p9 = scmp.eq.s32.totalorder %s1310_s18, 0  ;;  %p65_p11 = scmp.ne.s32.totalorder %s1294_s14, %s1290_s13 }
  0x25   : > { %s1631_s20 = smov (%p45_p7, %s43_s20), 0  ;;  %p285_p12 = scmp.eq.s32.totalorder %s1404_s19, 1 }
  0x26   : > { %1613 = sst [smem:[#allocation23_spill]] %s1631_s20  ;;  %p1450_p10 = por %p60_p9, %p59_p8 }
  0x27   : > { %s47_s3 = ssub.s32 %s1306_s17, %s1631_s20  ;;  %p1461_p0 = por %p66_p1, %p65_p11 }
  0x28   : > { %p50_p13 = scmp.eq.s32.totalorder %s47_s3, 0  ;;  %p1465_p2 = por %p285_p12, %p59_p8 }
  0x29   : > { %p291_p4 = scmp.eq.s32.totalorder %s890_s29, 1  ;;  %p964_p7 = scmp.lt.s32.totalorder %s1310_s18, 2 }
  0x2a   : > { %s1616_s30 = scalar_select %p1465_p2, 1, 0 }
  0x2b   : > { %s1470_s11 = scalar_select %p50_p13, %s1298_s15, %s52_s24  }
  0x2c   : > { %1617 = sst [smem:[#allocation24_spill]] %s1616_s30  ;;  %p1472_p5 = por %p291_p4, %p65_p11 }
  0x2d   : > { %1618 = sst [smem:[#allocation25_spill]] %s1470_s11  ;;  %s379_s28 = sand.u32 1, %s1298_s15  }
  0x2e   : > { %s1619_s27 = scalar_select %p1472_p5, 1, 0 }
  0x2f   : > { %s898_s22 = sshll.u32 %s1306_s17, 3  ;;  %s897_s25 = sshll.u32 %s379_s28, 3 }
  0x30   : > { %1620 = sst [smem:[#allocation26_spill]] %s1619_s27  ;;  %s388_s3 = scalar_lea.hbm %s1582_s0, %s898_s22 }
  0x31   : > { %s390_s4 = sshll.u32 %s388_s3, 4  ;;  %s383_s5 = scalar_lea.vmem [#allocation2], %s897_s25  ;;  %s391_s4 = int_to_ptr.hbm [resolvable:$true] %s390_s4 }
  0x32   : > { %s392_s20 = sshll.u32 %s383_s5, 4  ;;  %p950_p8 = pnand %p964_p7, %p1450_p10  ;;  %s393_s20 = int_to_ptr.vmem [resolvable:$true] %s392_s20 }
  0x33   : > { %s407_s11 = scalar_lea.hbm %s1583_s1, %s898_s22  ;;  %s399_s27 = sand.u32 1, %s1310_s18  }
  0x34   : > { %s380_s13 = scalar_lea.sflag [#allocation3], %s379_s28  ;;  %s409_s17 = sshll.u32 %s407_s11, 4  ;;  %s410_s17 = int_to_ptr.hbm [resolvable:$true] %s409_s17 }
  0x35   : > { %952 = dma.hbm_to_vmem [thread:$0]  (!%p950_p8), %s391_s4, 128, %s393_s20, %s380_s13  }
  0x36   : > { %s403_s15 = scalar_lea.vmem [#allocation5], %s897_s25  ;;  %s400_s12 = scalar_lea.sflag [#allocation6], %s399_s27 }
  0x37   : > { %s411_s30 = sshll.u32 %s403_s15, 4  ;;  %420 = sbr.rel (%p1412_p3) target bundleno = 762 (0x2fa), region = 60  ;;  %s412_s30 = int_to_ptr.vmem [resolvable:$true] %s411_s30 }
  0x38   : > { %955 = dma.hbm_to_vmem [thread:$0]  (!%p950_p8), %s410_s17, 128, %s412_s30, %s400_s12  }
  0x39   : > { %s1491_s5 = sand.u32 (!%p1412_p3), 1, %s1294_s14  }
  0x3a   : > { %s1494_s2 = sshll.u32 (!%p1412_p3), %s1491_s5, 3  ;;  %s423_s4 = scalar_lea.sflag (!%p1412_p3), [#allocation3], %s1491_s5 }
  0x3b   : > { %s426_s13 = scalar_lea.vmem (!%p1412_p3), [#allocation2], %s1494_s2 }
  0x3c   : > { %1265 = dma.done.wait (%p1461_p0), %s423_s4, 128  }
  0x3d   : > { %1267 = vsyncadd (%p1461_p0), %s423_s4, 4294967168  ;;  %s432_s15 = sand.u32 1, %s1404_s19   ;;  %s436_s23 = scalar_lea.vmem [#allocation5], %s1494_s2 }
  0x3e   : > { %s433_s17 = scalar_lea.sflag [#allocation6], %s432_s15 }
  0x3f   : > { %1269 = dma.done.wait (%p1461_p0), %s433_s17, 128  }
  0x40   : > { %1271 = vsyncadd (%p1461_p0), %s433_s17, 4294967168 }
  0x41   : > { %1273 = dma.done.wait (%p66_p1), [#allocation6], 2048  }
  0x42   : > { %1275 = vsyncadd (%p66_p1), [#allocation6], 4294965248 }
  0x43   : > { %1277 = dma.done.wait (%p66_p1), [#allocation9], 4096  }
  0x44   : > { %1279 = vsyncadd (%p66_p1), [#allocation9], 4294963200 }
  0x45   : > { %1281 = dma.done.wait (%p66_p1), [#allocation12], 2048  }
  0x46   : > { %1283 = vsyncadd (%p66_p1), [#allocation12], 4294965248  ;;  %v556_v0 = vld [vmem:[#allocation8 + $0x78] sm:$0xff]  ;;  %v555_v1 = vld [vmem:[#allocation8 + $0x70] sm:$0xff]  ;;  %vm641_vm0 = vcmask 64512   ;;  %s911_s28 = sshll.u32 %s1302_s16, 3 }
  0x47   : > { %v515_v2 = vld [vmem:[#allocation7 + $0x78] sm:$0xff]  ;;  %561 = vmatpush.msra.mxu1 %v556_v0  ;;  %v514_v3 = vld [vmem:[#allocation7 + $0x70] sm:$0xff]  ;;  %v554_v4 = vld [vmem:[#allocation8 + $0x68] sm:$0xff]  ;;  %s743_s24 = scalar_lea.hbm %s1592_s10, %s911_s28  ;;  %s498_s12 = scalar_lea.vmem [#allocation13], %s1494_s2 }
  0x48   : > { %520 = vmatpush.msra.mxu0 %v515_v2  ;;  %v513_v5 = vld [vmem:[#allocation7 + $0x68] sm:$0xff]  ;;  %v553_v6 = vld [vmem:[#allocation8 + $0x60] sm:$0xff]  ;;  %v552_v8 = vld [vmem:[#allocation8 + $0x58] sm:$0xff]  ;;  %s745_s4 = sshll.u32 %s498_s12, 4  ;;  %s732_s16 = scalar_lea.sflag [#allocation4], %s1491_s5  ;;  %s746_s4 = int_to_ptr.vmem [resolvable:$true] %s745_s4 }
  0x49   : > { %562 = vmatpush.msra.mxu1 %v555_v1  ;;  %v512_v7 = vld [vmem:[#allocation7 + $0x60] sm:$0xff]  ;;  %v511_v9 = vld [vmem:[#allocation7 + $0x58] sm:$0xff]  ;;  %v551_v10 = vld [vmem:[#allocation8 + $0x50] sm:$0xff]  ;;  %s1232_s2 = scalar_lea.hbm %s1592_s10, 16 }
  0x4a   : > { %521 = vmatpush.msra.mxu0 %v514_v3  ;;  %v510_v11 = vld [vmem:[#allocation7 + $0x50] sm:$0xff]  ;;  %v550_v12 = vld [vmem:[#allocation8 + $0x48] sm:$0xff]  ;;  %v549_v14 = vld [vmem:[#allocation8 + $0x40] sm:$0xff] }
  0x4b   : > { %563 = vmatpush.msra.mxu1 %v554_v4  ;;  %v509_v13 = vld [vmem:[#allocation7 + $0x48] sm:$0xff]  ;;  %v508_v15 = vld [vmem:[#allocation7 + $0x40] sm:$0xff]  ;;  %v548_v16 = vld [vmem:[#allocation8 + $0x38] sm:$0xff] }
  0x4c   : > { %522 = vmatpush.msra.mxu0 %v513_v5  ;;  %v507_v17 = vld [vmem:[#allocation7 + $0x38] sm:$0xff]  ;;  %v547_v18 = vld [vmem:[#allocation8 + $0x30] sm:$0xff]  ;;  %v546_v20 = vld [vmem:[#allocation8 + $0x28] sm:$0xff] }
  0x4d   : > { %564 = vmatpush.msra.mxu1 %v553_v6  ;;  %v506_v19 = vld [vmem:[#allocation7 + $0x30] sm:$0xff]  ;;  %v505_v21 = vld [vmem:[#allocation7 + $0x28] sm:$0xff]  ;;  %v545_v22 = vld [vmem:[#allocation8 + $0x20] sm:$0xff] }
  0x4e   : > { %523 = vmatpush.msra.mxu0 %v512_v7  ;;  %v504_v23 = vld [vmem:[#allocation7 + $0x20] sm:$0xff]  ;;  %v544_v24 = vld [vmem:[#allocation8 + $0x18] sm:$0xff]  ;;  %v543_v26 = vld [vmem:[#allocation8 + $0x10] sm:$0xff] }
  0x4f   : > { %565 = vmatpush.msra.mxu1 %v552_v8  ;;  %v503_v25 = vld [vmem:[#allocation7 + $0x18] sm:$0xff]  ;;  %v502_v27 = vld [vmem:[#allocation7 + $0x10] sm:$0xff]  ;;  %v542_v28 = vld [vmem:[#allocation8 + $0x8] sm:$0xff] }
  0x50   : > { %524 = vmatpush.msra.mxu0 %v511_v9  ;;  %v501_v29 = vld [vmem:[#allocation7 + $0x8] sm:$0xff]  ;;  %v541_v30 = vld [vmem:[#allocation8] sm:$0xff]  ;;  %v540_v32 = vld [vmem:[%s436_s23] sm:$0xff] }
  0x51   : > { %566 = vmatpush.msra.mxu1 %v551_v10  ;;  %v500_v31 = vld [vmem:[#allocation7] sm:$0xff]  ;;  %v596_v34 = vld [vmem:[#allocation10 + $0x78] sm:$0xff]  ;;  %v595_v35 = vld [vmem:[#allocation10 + $0x70] sm:$0xff] }
  0x52   : > { %525 = vmatpush.msra.mxu0 %v510_v11  ;;  %v1524_v33 = vld [vmem:[%s426_s13] sm:$0xff]  ;;  %601 = vmatpush.msra.mxu2 %v596_v34  ;;  %v592_v38 = vld [vmem:[#allocation10 + $0x58] sm:$0xff]  ;;  %v591_v39 = vld [vmem:[#allocation10 + $0x50] sm:$0xff]  ;;  %s747_s13 = sshll.u32 %s743_s24, 4  ;;  %s748_s13 = int_to_ptr.hbm [resolvable:$true] %s747_s13 }
  0x53   : > { %567 = vmatpush.msra.mxu1 %v550_v12  ;;  %v594_v36 = vld [vmem:[#allocation10 + $0x68] sm:$0xff]  ;;  %v593_v37 = vld [vmem:[#allocation10 + $0x60] sm:$0xff]  ;;  %v588_v42 = vld [vmem:[#allocation10 + $0x38] sm:$0xff]  ;;  %s1226_s15 = sshra.s32 %s748_s13, 4  ;;  %s1227_s15 = int_to_ptr.hbm [resolvable:$true] %s1226_s15 }
  0x54   : > { %526 = vmatpush.msra.mxu0 %v509_v13  ;;  %602 = vmatpush.msra.mxu2 %v595_v35  ;;  %v590_v40 = vld [vmem:[#allocation10 + $0x48] sm:$0xff]  ;;  %v589_v41 = vld [vmem:[#allocation10 + $0x40] sm:$0xff]  ;;  %v587_v43 = vld [vmem:[#allocation10 + $0x30] sm:$0xff]  ;;  %s1228_s17 = scalar_lea.hbm %s1227_s15, 8  ;;  %p1233_p10 = scmp.lt.s32.totalorder %s1227_s15, %s1592_s10 }
  0x55   : > { %568 = vmatpush.msra.mxu1 %v549_v14  ;;  %v586_v44 = vld [vmem:[#allocation10 + $0x28] sm:$0xff]  ;;  %v585_v45 = vld [vmem:[#allocation10 + $0x20] sm:$0xff]  ;;  %v584_v46 = vld [vmem:[#allocation10 + $0x18] sm:$0xff]  ;;  %p1229_p1 = scmp.ne.s32.totalorder %s1227_s15, %s1228_s17  ;;  %p1234_p11 = scmp.lt.s32.totalorder %s1232_s2, %s1228_s17 }
  0x56   : > { %527 = vmatpush.msra.mxu0 %v508_v15  ;;  %603 = vmatpush.msra.mxu2 %v594_v36  ;;  %v1024_v47 = vld [vmem:[%s1589_s7] ss:$0 sm:$0xff]  ;;  %v583_v49 = vld [vmem:[#allocation10 + $0x10] sm:$0xff]  ;;  %v582_v52 = vld [vmem:[#allocation10 + $0x8] sm:$0xff] }
  0x57   : > { %569 = vmatpush.msra.mxu1 %v548_v16  ;;  %v1025_v48 = vld [vmem:[%s1588_s6] ss:$0 sm:$0xff]  ;;  %v704_v61 = vld [vmem:[#allocation11 + $0x78] sm:$0xff]  ;;  %v703_v62 = vld [vmem:[#allocation11 + $0x70] sm:$0xff]  ;;  %p1230_p3 = pnand %p1229_p1, %p1465_p2  ;;  %p1235_p12 = por %p1234_p11, %p1233_p10 }
  0x58   : > { %528 = vmatpush.msra.mxu0 %v507_v17  ;;  %604 = vmatpush.msra.mxu2 %v593_v37  ;;  %v581_v55 = vld [vmem:[#allocation10] sm:$0xff]  ;;  %v702_v63 = vld [vmem:[#allocation11 + $0x68] sm:$0xff]  ;;  %v700_v1 = vld [vmem:[#allocation11 + $0x58] sm:$0xff] }
  0x59   : > { %570 = vmatpush.msra.mxu1 %v547_v18  ;;  %v1026_v59 = vld [vmem:[%s1590_s8] ss:$0 sm:$0xff]  ;;  %v699_v2 = vld [vmem:[#allocation11 + $0x50] sm:$0xff]  ;;  %v698_v8 = vld [vmem:[#allocation11 + $0x48] sm:$0xff]  ;;  %p1231_p9 = pneg %p1230_p3 }
  0x5a   : > { %529 = vmatpush.msra.mxu0 %v506_v19  ;;  %605 = vmatpush.msra.mxu2 %v592_v38  ;;  %v701_v0 = vld [vmem:[#allocation11 + $0x60] sm:$0xff]  ;;  %v696_v10 = vld [vmem:[#allocation11 + $0x38] sm:$0xff]  ;;  %v695_v11 = vld [vmem:[#allocation11 + $0x30] sm:$0xff] }
  0x5b   : > { %571 = vmatpush.msra.mxu1 %v546_v20  ;;  %v697_v9 = vld [vmem:[#allocation11 + $0x40] sm:$0xff]  ;;  %v694_v12 = vld [vmem:[#allocation11 + $0x28] sm:$0xff]  ;;  %v692_v14 = vld [vmem:[#allocation11 + $0x18] sm:$0xff]  ;;  %p1236_p13 = pnand %p1235_p12, %p1231_p9 }
  0x5c   : > { %530 = vmatpush.msra.mxu0 %v505_v21  ;;  %606 = vmatpush.msra.mxu2 %v591_v39  ;;  %v693_v13 = vld [vmem:[#allocation11 + $0x20] sm:$0xff]  ;;  %v691_v15 = vld [vmem:[#allocation11 + $0x10] sm:$0xff]  ;;  %v690_v16 = vld [vmem:[#allocation11 + $0x8] sm:$0xff] }
  0x5d   : > { %572 = vmatpush.msra.mxu1 %v545_v22  ;;  %v689_v17 = vld [vmem:[#allocation11] sm:$0xff] }
  0x5e   : > { %531 = vmatpush.msra.mxu0 %v504_v23  ;;  %607 = vmatpush.msra.mxu2 %v590_v40 }
  0x5f   : > { %573 = vmatpush.msra.mxu1 %v544_v24 }
  0x60   : > { %532 = vmatpush.msra.mxu0 %v503_v25  ;;  %608 = vmatpush.msra.mxu2 %v589_v41 }
  0x61   : > { %574 = vmatpush.msra.mxu1 %v543_v26 }
  0x62   : > { %533 = vmatpush.msra.mxu0 %v502_v27  ;;  %609 = vmatpush.msra.mxu2 %v588_v42 }
  0x63   : > { %575 = vmatpush.msra.mxu1 %v542_v28 }
  0x64   : > { %534 = vmatpush.msra.mxu0 %v501_v29  ;;  %610 = vmatpush.msra.mxu2 %v587_v43 }
  0x65   : > { %576 = vmatpush.msra.mxu1 %v541_v30 }
  0x66   : > { %535 = vmatpush.msra.mxu0 %v500_v31  ;;  %577 = vmatmul.f32.vlgmr.msra.gmra.mxu1 %v540_v32  ;;  %v1027_v31 = vld [vmem:[%s1591_s9] ss:$0 sm:$0xff] }
  0x67   : > { %536 = vmatmul.f32.vlgmr.msra.gmra.mxu0 %v1524_v33  ;;  %611 = vmatpush.msra.mxu2 %v586_v44 }
  0x69   : > { %612 = vmatpush.msra.mxu2 %v585_v45 }
  0x6b   : > { %613 = vmatpush.msra.mxu2 %v584_v46 }
  0x6d   : > { %614 = vmatpush.msra.mxu2 %v583_v49 }
  0x6f   : > { %615 = vmatpush.msra.mxu2 %v582_v52 }
  0x71   : > { %616 = vmatpush.msra.mxu2 %v581_v55 }
  0x72   : > { %617 = vmatmul.f32.vlgmr.msra.gmra.mxu2 %v540_v32 }
  0xe3   : > { %v578_v50 = vpop.f32.mrf.mxu1 }
  0xe4   : > { %v537_v51 = vpop.f32.mrf.mxu0  ;;  %v579_v53 = vadd.f32 %v1024_v47, %v578_v50 }
  0xe5   : > { %v538_v54 = vadd.f32 %v1025_v48, %v537_v51 }
  0xe6   : > { %636 = vmatpush.xpose.msrb.mxu0 %v579_v53 }
  0xe9   : > { %637 = vmatmul.f32.vlgmr.msrb.gmra.mxu0 %v538_v54 }
  0xf5   : > { %v618_v58 = vpop.f32.mrf.mxu2 }
  0xf6   : > { %v619_v60 = vadd.f32 %v1026_v59, %v618_v58 }
  0xf8   : > { %669 = vmatpush.msra.mxu3 %v619_v60 }
  0xfa   : > { %709 = vmatpush.msrb.mxu3 %v704_v61 }
  0xfc   : > { %710 = vmatpush.msrb.mxu3 %v703_v62 }
  0xfe   : > { %711 = vmatpush.msrb.mxu3 %v702_v63 }
 0x100   : > { %712 = vmatpush.msrb.mxu3 %v701_v0 }
 0x102   : > { %713 = vmatpush.msrb.mxu3 %v700_v1 }
 0x104   : > { %714 = vmatpush.msrb.mxu3 %v699_v2 }
 0x106   : > { %715 = vmatpush.msrb.mxu3 %v698_v8 }
 0x108   : > { %716 = vmatpush.msrb.mxu3 %v697_v9 }
 0x10a   : > { %717 = vmatpush.msrb.mxu3 %v696_v10 }
 0x10c   : > { %718 = vmatpush.msrb.mxu3 %v695_v11 }
 0x10e   : > { %719 = vmatpush.msrb.mxu3 %v694_v12 }
 0x110   : > { %720 = vmatpush.msrb.mxu3 %v693_v13 }
 0x112   : > { %721 = vmatpush.msrb.mxu3 %v692_v14 }
 0x114   : > { %722 = vmatpush.msrb.mxu3 %v691_v15 }
 0x116   : > { %723 = vmatpush.msrb.mxu3 %v690_v16 }
 0x118   : > { %724 = vmatpush.msrb.mxu3 %v689_v17 }
 0x166   : > { %v638_v56 = vpop.f32.mrf.mxu0 }
 0x167   : > { %v642_v57 = vsel %vm641_vm0, %v638_v56, -inf }
 0x168   : > { %643 = vmax.xlane.f32.xlu0 %v642_v57 }
 0x1db   : > { %v644_v3 = vpop.xlane.xlu0 %643 }
 0x1dc   : > { %v645_v4 = vsub.f32 %v638_v56, %v644_v3 }
 0x1de   : > { %v646_v5 = vmul.f32 1.442695, %v645_v4 }
 0x1e0   : > { %1028 = vpow2.f32 %v646_v5 }
 0x1e6   : > { %v1029_v6 = vpop.eup %1028 }
 0x1e7   : > { %909 = vmatmul.msk.f32.vlgmr.msra.gmra.mxu3 %vm641_vm0, %v1029_v6  ;;  %v648_v7 = vsel %vm641_vm0, %v1029_v6, 0.0 }
 0x1e8   : > { %649 = vadd.xlane.f32.xlu0 %v648_v7 }
 0x25b   : > { %v650_v18 = vpop.xlane.xlu0 %649 }
 0x25c   : > { %1030 = vrcp.f32 %v650_v18  ;;  %v685_v22 = vand.u32 2147483648, %v650_v18  ;;  %v683_v24 = vand.u32 2147483647, %v650_v18  ;;  %vm679_vm2 = vweird.f32 %v650_v18 }
 0x25e   : > { %v686_v26 = vor.u32 1.1754944e-38, %v685_v22  ;;  %vm684_vm4 = vcmp.eq.f32.partialorder %v683_v24, 8.507059e+37 }
 0x262   : > { %v1031_v19 = vpop.eup %1030 }
 0x263   : > { %v675_v20 = vmul.f32 %v1031_v19, %v650_v18  ;;  %vm680_vm1 = vweird.f32 %v1031_v19 }
 0x264   : > { %vm681_vm3 = vmor %vm679_vm2, %vm680_vm1 }
 0x265   : > { %v676_v21 = vsub.f32 1.0, %v675_v20 }
 0x267   : > { %v677_v23 = vmul.f32 %v1031_v19, %v676_v21 }
 0x269   : > { %v678_v25 = vadd.f32 %v1031_v19, %v677_v23 }
 0x26a   : > { %v671_v28 = vpop.f32.mrf.mxu3 }
 0x26b   : > { %v682_v27 = vsel %vm681_vm3, %v1031_v19, %v678_v25 }
 0x26c   : > { %v687_v29 = vsel %vm684_vm4, %v686_v26, %v682_v27 }
 0x26d   : > { %v688_v30 = vmul.f32 %v687_v29, %v671_v28 }
 0x26f   : > { %725 = vmatmul.f32.vlgmr.msrb.gmra.mxu3 %v688_v30 }
 0x2f2   : > { %v726_v32 = vpop.f32.mrf.mxu3 }
 0x2f3   : > { %v727_v34 = vadd.f32 %v1027_v31, %v726_v32 }
 0x2f5   : > { %v729_v35 = vadd.f32 %v727_v34, %v1524_v33 }
 0x2f7   : > { %730 = vst [vmem:[%s498_s12] sm:$0xff] %v729_v35 }
 0x2f8   : > { %1239 = shalt.err (!%p1236_p13)
}
 0x2f9   : > { %934 = dma.vmem_to_hbm [thread:$0]  (%p1465_p2), %s746_s4, 128, %s748_s13, %s732_s16  }
 0x2fa PF: > { %s1622_s5 = sld [smem:[#allocation20_spill]]  ;;  %p957_p0 = pnand %p896_p6, %p1472_p5 }
 0x2fc   : > { %p958_p4 = pneg %p957_p0 }
 0x300   : > { %s759_s11 = sand.u32 1, %s1622_s5  }
 0x301   : > { %s760_s27 = scalar_lea.sflag [#allocation4], %s759_s11 }
 0x302   : > { %1285 = dma.done.wait (%p958_p4), %s760_s27, 128  }
 0x303   : > { %1287 = vsyncadd (%p958_p4), %s760_s27, 4294967168  ;;  %s31_s18 = sadd.s32 1, %s1310_s18   ;;  %s1624_s28 = sld [smem:[#allocation21_spill]] }
 0x304   : > { %p28_p7 = scmp.ge.s32.totalorder %s31_s18, 4   ;;  %s1625_s15 = sld [smem:[#allocation25_spill]] }
 0x305   : > { %s1626_s16 = sld [smem:[#allocation22_spill]]  ;;  %s1628_s13 = smov %s1294_s14 }
 0x306   : > { %s1627_s17 = sld [smem:[#allocation23_spill]]  ;;  %30 = sbr.rel (!%p28_p7) target bundleno = 15 (0xf), region = 134 }
 0x309   : > { %s1629_s14 = smov %s1624_s28 }
 0x30b   :  { %766 = vsyncpa [#allocation3], 1 }
 0x30c   :  { %768 = vsyncpa [#allocation3 + $0x1], 1 }
 0x30d   :  { %769 = vsyncpa [#allocation6], 1 }
 0x30e   :  { %771 = vsyncpa [#allocation6 + $0x1], 1 }
 0x30f   :  { %772 = vsyncpa [#allocation9], 1 }
 0x310   :  { %773 = vsyncpa [#allocation12], 1 }
 0x311   :  { %774 = vsyncpa [#allocation4], 1 }
 0x312   :  { %776 = vsyncpa [#allocation4 + $0x1], 1 }

</bundles_post_ra>
